<compile_context>
chip_gen: v6e
topology: v6e:2x2x1
jax: 0.10.0
libtpu: 0.0.40
codegen_flags: <defaults>
</compile_context>

<pallas_src>
import functools

import jax
import jax.numpy as jnp
from jax.experimental import pallas as pl
from jax.experimental.pallas import tpu as pltpu

LANE = 128  # TPU lane width; pad all matmul-facing dims to this


def _round_up(x, m):
    return (x + m - 1) // m * m


# ---------------------------------------------------------------------------
# VMEM budgeting (per-generation)
# ---------------------------------------------------------------------------
def _vmem_cap_bytes():
    try:
        return int(pltpu.get_tpu_info().vmem_capacity_bytes)
    except Exception:
        return 64 * 1024 * 1024  # conservative fallback (v7x per-TC)


def _vmem_limit_bytes(need_bytes):
    cap = _vmem_cap_bytes()
    return int(min(cap * 0.92, max(need_bytes * 1.2, 32 * 1024 * 1024)))


def _resident_need_bytes(n_pad, cp, nc_pad, lg):
    return (n_pad * n_pad * 2            # L (bf16), resident
            + n_pad * cp * 4             # x input (f32)
            + n_pad * 10 * 1024          # per-row f32/bf16 temps (x0/x1/x2/h/out)
            + lg * 3 * cp * cp * 2       # stacked Chebyshev weights (bf16)
            + cp * 256 * 2 + 256 * nc_pad * 2 + (256 + nc_pad) * 4
            + (2 << 20))                 # slack


def _use_resident(n_pad, cp, nc_pad, lg):
    return _resident_need_bytes(n_pad, cp, nc_pad, lg) * 1.2 <= _vmem_cap_bytes() * 0.8


def _pick_row_tile(n_pad):
    for tm in (512, 256, 128):
        if n_pad % tm == 0:
            return tm
    return n_pad


# ---------------------------------------------------------------------------
# Kernel A: fully VMEM-resident (single invocation, no grid)
# ---------------------------------------------------------------------------
def _resident_kernel(lg, l_ref, x_ref, wst_ref, w1_ref, b1_ref, w2_ref, b2_ref, o_ref):
    cp = x_ref.shape[1]
    L = l_ref[...]                                   # bf16 [Np, Np]
    x_f32 = x_ref[...]                               # f32  [Np, Cp]
    x_bf = x_f32.astype(jnp.bfloat16)

    for i in range(lg):
        # Chebyshev recursion (lambda_max = 2 => L_hat = L_sym - I):
        #   Tx0 = x ; Tx1 = L_hat @ x ; Tx2 = 2 * L_hat @ Tx1 - Tx0
        x0_bf = x_bf
        x1 = jnp.dot(L, x0_bf, preferred_element_type=jnp.float32)
        x1_bf = x1.astype(jnp.bfloat16)
        x2 = 2.0 * jnp.dot(L, x1_bf, preferred_element_type=jnp.float32) - x_f32
        # Three accumulated dots against 128-row slices of the weight slab
        # (replaces the f32 concat + single wide dot).
        acc = jnp.dot(x0_bf, wst_ref[i, :cp, :], preferred_element_type=jnp.float32)
        acc = acc + jnp.dot(x1_bf, wst_ref[i, cp:2 * cp, :],
                            preferred_element_type=jnp.float32)
        acc = acc + jnp.dot(x2.astype(jnp.bfloat16), wst_ref[i, 2 * cp:, :],
                            preferred_element_type=jnp.float32)
        x_f32 = jnp.maximum(acc, 0.0)
        x_bf = x_f32.astype(jnp.bfloat16)

    # Classifier head: Linear -> ReLU -> (BN folded) Linear
    h = jnp.dot(x_bf, w1_ref[...], preferred_element_type=jnp.float32) + b1_ref[...]
    h = jnp.maximum(h, 0.0)
    o_ref[...] = jnp.dot(h.astype(jnp.bfloat16), w2_ref[...],
                         preferred_element_type=jnp.float32) + b2_ref[...]


def _resident_call(lg, n_pad, cp, nc_pad, *operands):
    vmem = pl.BlockSpec(memory_space=pltpu.MemorySpace.VMEM)
    need = _resident_need_bytes(n_pad, cp, nc_pad, lg)
    return pl.pallas_call(
        functools.partial(_resident_kernel, lg),
        out_shape=jax.ShapeDtypeStruct((n_pad, nc_pad), jnp.float32),
        in_specs=[vmem] * len(operands),
        out_specs=vmem,
        compiler_params=pltpu.CompilerParams(
            vmem_limit_bytes=_vmem_limit_bytes(need)),
    )(*operands)


# ---------------------------------------------------------------------------
# Kernel B: streamed / row-tiled L  (grid = (lg, 2 passes, row blocks))
#   pass 0: x1[rb] = L[rb,:] @ x          (x fully resident in VMEM scratch)
#   pass 1: x2[rb] = 2 * L[rb,:] @ x1 - x0[rb]; x[rb] <- relu(stacked matmul)
#           last layer also applies the classifier head and writes the output.
# L is read exactly twice per layer, double-buffered against the dots.
# ---------------------------------------------------------------------------
def _streamed_kernel(cp, l_ref, x_ref, wst_ref, w1_ref, b1_ref, w2_ref, b2_ref,
                     o_ref, x_scr, x1_scr):
    layer = pl.program_id(0)
    phase = pl.program_id(1)
    rblk = pl.program_id(2)
    tm = l_ref.shape[0]
    row0 = pl.multiple_of(rblk * tm, tm)

    @pl.when((layer == 0) & (phase == 0) & (rblk == 0))
    def _():
        x_scr[...] = x_ref[...].astype(jnp.bfloat16)

    l_blk = l_ref[...]                                # bf16 [tm, Np]

    @pl.when(phase == 0)
    def _():
        x1 = jnp.dot(l_blk, x_scr[...], preferred_element_type=jnp.float32)
        x1_scr[pl.ds(row0, tm), :] = x1.astype(jnp.bfloat16)

    @pl.when(phase == 1)
    def _():
        x0_bf = x_scr[pl.ds(row0, tm), :]
        x1_bf = x1_scr[pl.ds(row0, tm), :]
        x2 = (2.0 * jnp.dot(l_blk, x1_scr[...], preferred_element_type=jnp.float32)
              - x0_bf.astype(jnp.float32))
        w = wst_ref[0]
        acc = jnp.dot(x0_bf, w[:cp, :], preferred_element_type=jnp.float32)
        acc = acc + jnp.dot(x1_bf, w[cp:2 * cp, :], preferred_element_type=jnp.float32)
        acc = acc + jnp.dot(x2.astype(jnp.bfloat16), w[2 * cp:, :],
                            preferred_element_type=jnp.float32)
        x_scr[pl.ds(row0, tm), :] = jnp.maximum(acc, 0.0).astype(jnp.bfloat16)

    @pl.when((phase == 1) & (layer == pl.num_programs(0) - 1))
    def _():
        xr = x_scr[pl.ds(row0, tm), :]
        h = jnp.dot(xr, w1_ref[...], preferred_element_type=jnp.float32) + b1_ref[...]
        h = jnp.maximum(h, 0.0)
        o_ref[...] = jnp.dot(h.astype(jnp.bfloat16), w2_ref[...],
                             preferred_element_type=jnp.float32) + b2_ref[...]


def _streamed_call(lg, n_pad, cp, nc_pad, *operands):
    tm = _pick_row_tile(n_pad)
    nb = n_pad // tm

    l_spec = pl.BlockSpec((tm, n_pad), lambda l, p, r: (r, 0))
    x_spec = pl.BlockSpec((n_pad, cp), lambda l, p, r: (0, 0))
    w_spec = pl.BlockSpec((1, 3 * cp, cp), lambda l, p, r: (l, 0, 0))
    w1_spec = pl.BlockSpec(operands[3].shape, lambda l, p, r: (0, 0))
    b1_spec = pl.BlockSpec(operands[4].shape, lambda l, p, r: (0, 0))
    w2_spec = pl.BlockSpec(operands[5].shape, lambda l, p, r: (0, 0))
    b2_spec = pl.BlockSpec(operands[6].shape, lambda l, p, r: (0, 0))
    out_spec = pl.BlockSpec((tm, nc_pad), lambda l, p, r: (r, 0))

    need = (2 * tm * n_pad * 2          # L row blocks, double-buffered
            + 2 * n_pad * cp * 4        # x input (f32), conservatively x2
            + 2 * n_pad * cp * 2        # x / x1 scratch (bf16)
            + 2 * 3 * cp * cp * 2       # weight slab, double-buffered
            + 2 * tm * nc_pad * 4       # output blocks
            + tm * 16 * 1024            # per-row temps
            + (2 << 20))

    return pl.pallas_call(
        functools.partial(_streamed_kernel, cp),
        out_shape=jax.ShapeDtypeStruct((n_pad, nc_pad), jnp.float32),
        grid=(lg, 2, nb),
        in_specs=[l_spec, x_spec, w_spec, w1_spec, b1_spec, w2_spec, b2_spec],
        out_specs=out_spec,
        scratch_shapes=[pltpu.VMEM((n_pad, cp), jnp.bfloat16),
                        pltpu.VMEM((n_pad, cp), jnp.bfloat16)],
        compiler_params=pltpu.CompilerParams(
            dimension_semantics=("arbitrary", "arbitrary", "arbitrary"),
            vmem_limit_bytes=_vmem_limit_bytes(need)),
    )(*operands)


# ---------------------------------------------------------------------------
# Glue: dense rescaled Laplacian (PyG ChebConv, normalization='sym',
# lambda_max=2.0  =>  L_hat = -D^{-1/2} A D^{-1/2}, zero diagonal), built
# directly at padded size and in the kernel's dtype (padded rows/cols are 0).
# NOTE: matches PyG only for symmetric edge lists (both directions present).
# ---------------------------------------------------------------------------
def build_scaled_laplacian(edge_index, edge_weight, num_nodes, out_dtype=jnp.float32):
    row, col = edge_index[0], edge_index[1]
    keep = row != col                                  # remove_self_loops
    w = jnp.where(keep, edge_weight, 0.0)
    deg = jnp.zeros((num_nodes,), jnp.float32).at[row].add(w)
    dinv = jnp.where(deg > 0, jax.lax.rsqrt(deg), 0.0)
    norm = dinv[row] * w * dinv[col]
    # aggregation at target node col: L_hat[col, row] = -norm
    L = jnp.zeros((num_nodes, num_nodes), out_dtype).at[col, row].add(
        (-norm).astype(out_dtype))
    return L


# ---------------------------------------------------------------------------
# Parameters (deterministic init) and packing (pad / stack / BN-fold)
# ---------------------------------------------------------------------------
def init_gcn_params(key, input_dim, num_classes, hgc, lg, K=3):
    params = {"gconv": []}
    for i in range(lg):
        c_in = input_dim if i == 0 else hgc
        ws = []
        for _ in range(K):
            key, sub = jax.random.split(key)
            ws.append(jax.random.normal(sub, (c_in, hgc), jnp.float32)
                      * jnp.sqrt(2.0 / (c_in + hgc)))       # glorot-ish, [in, out]
        params["gconv"].append(ws)

    key, k1, k2 = jax.random.split(key, 3)
    params["cls_w1"] = jax.random.normal(k1, (hgc, 256), jnp.float32) * jnp.sqrt(2.0 / hgc)
    params["cls_b1"] = jnp.zeros((1, 256), jnp.float32)
    params["bn_gamma"] = jnp.ones((1, 256), jnp.float32)
    params["bn_beta"] = jnp.zeros((1, 256), jnp.float32)
    params["bn_mean"] = jnp.zeros((1, 256), jnp.float32)
    params["bn_var"] = jnp.ones((1, 256), jnp.float32)
    params["cls_w2"] = jax.random.normal(k2, (256, num_classes), jnp.float32) * jnp.sqrt(2.0 / 256)
    params["cls_b2"] = jnp.zeros((1, num_classes), jnp.float32)
    return params


def pack_params(params, input_dim, num_classes, hgc, lg):
    """Pad to 128-lane shapes, stack Chebyshev weights per layer (K=3 slots of
    128-row slices), fold BatchNorm (eval) into the last Linear."""
    cp = max(_round_up(input_dim, LANE), _round_up(hgc, LANE))
    ncp = _round_up(num_classes, LANE)

    wst = jnp.zeros((lg, 3 * cp, cp), jnp.float32)
    for i in range(lg):
        ws = params["gconv"][i]                        # K x [c_in, c_out]
        assert len(ws) == 3, "kernel Chebyshev recursion is hard-coded for K=3"
        for k, w in enumerate(ws):
            c_in, c_out = w.shape
            wst = wst.at[i, k * cp:k * cp + c_in, :c_out].set(w)

    packed = {"wstack": wst.astype(jnp.bfloat16)}

    hdim = params["cls_w1"].shape[1]                   # 256
    w1p = jnp.zeros((cp, hdim), jnp.float32).at[:hgc, :].set(params["cls_w1"])
    packed["cls_w1"] = w1p.astype(jnp.bfloat16)
    packed["cls_b1"] = params["cls_b1"].reshape(1, hdim)

    # Fold BatchNorm (eval) into cls Linear 2:
    #   BN(h) = (h - mean) * scale + beta,  scale = gamma * rsqrt(var + eps)
    #   BN(h) @ W2 + b2 = h @ (scale^T * W2) + ((beta - mean*scale) @ W2 + b2)
    scale = params["bn_gamma"] * jax.lax.rsqrt(params["bn_var"] + 1e-5)   # [1, 256]
    w2f = params["cls_w2"] * scale.reshape(-1, 1)
    b2f = (params["bn_beta"] - params["bn_mean"] * scale) @ params["cls_w2"] + params["cls_b2"]

    packed["cls_w2"] = jnp.zeros((hdim, ncp), jnp.float32).at[:, :num_classes].set(
        w2f).astype(jnp.bfloat16)
    packed["cls_b2"] = jnp.zeros((1, ncp), jnp.float32).at[:, :num_classes].set(b2f)
    return packed


# ---------------------------------------------------------------------------
# Forward pass
# ---------------------------------------------------------------------------
@functools.partial(jax.jit, static_argnames=("lg", "num_classes", "mode"))
def gcn_forward(packed, features, edge_index, edge_weight, lg, num_classes, mode="auto"):
    n, c = features.shape
    n_pad = _round_up(n, LANE)
    cp = packed["wstack"].shape[2]          # padded channel width (static)
    nc_pad = packed["cls_b2"].shape[1]      # padded class width  (static)

    # L_hat built directly at padded size, emitted in bf16 (padded rows/cols 0).
    L_pad = build_scaled_laplacian(edge_index, edge_weight, n_pad,
                                   out_dtype=jnp.bfloat16)
    x_pad = jnp.pad(features.astype(jnp.float32), ((0, n_pad - n), (0, cp - c)))

    operands = (L_pad, x_pad, packed["wstack"], packed["cls_w1"],
                packed["cls_b1"], packed["cls_w2"], packed["cls_b2"])

    if mode == "resident":
        resident = True
    elif mode == "streamed":
        resident = False
    else:  # per-generation crossover: resident L whenever it fits the budget
        resident = _use_resident(n_pad, cp, nc_pad, lg)

    if resident:
        out_pad = _resident_call(lg, n_pad, cp, nc_pad, *operands)
    else:
        out_pad = _streamed_call(lg, n_pad, cp, nc_pad, *operands)

    logit = out_pad[:n, :num_classes]
    return logit, edge_weight


# ---------------------------------------------------------------------------
if __name__ == "__main__":
    key = jax.random.PRNGKey(0)

    # small synthetic config
    N = 16
    INPUT_DIM = 16
    NUM_CLASSES = 4
    HGC = 32
    LG = 2
    K = 3

    # undirected ring graph (both directions, symmetric weights)
    src = jnp.arange(N, dtype=jnp.int32)
    dst = (src + 1) % N
    edge_index = jnp.stack([jnp.concatenate([src, dst]),
                            jnp.concatenate([dst, src])], axis=0)      # [2, 2N]
    key, kw, kf = jax.random.split(key, 3)
    w_half = jax.random.uniform(kw, (N,), jnp.float32, 0.5, 1.5)
    edge_weight = jnp.concatenate([w_half, w_half])                    # symmetric
    features = jax.random.normal(kf, (N, INPUT_DIM), jnp.float32)

    params = init_gcn_params(key, INPUT_DIM, NUM_CLASSES, HGC, LG, K=K)
    packed = pack_params(params, INPUT_DIM, NUM_CLASSES, HGC, LG)

    # run both variants: resident (small-graph fast path) and streamed
    # (row-tiled large-graph path), and cross-check them.
    logit_r, ew = gcn_forward(packed, features, edge_index, edge_weight,
                              lg=LG, num_classes=NUM_CLASSES, mode="resident")
    logit_s, _ = gcn_forward(packed, features, edge_index, edge_weight,
                             lg=LG, num_classes=NUM_CLASSES, mode="streamed")
    jax.block_until_ready((logit_r, logit_s, ew))

    assert logit_r.shape == (N, NUM_CLASSES)
    assert logit_s.shape == (N, NUM_CLASSES)
    assert bool(jnp.isfinite(logit_r).all())
    assert bool(jnp.isfinite(logit_s).all())
    assert bool(jnp.allclose(logit_r, logit_s, rtol=0.1, atol=0.1)), \
        float(jnp.max(jnp.abs(logit_r - logit_s)))
    print("KERNEL_OK")
</pallas_src>

<mosaic_0001>
module attributes {stable_mosaic.version = 11 : i64} {
  func.func private @main(%arg0: i32) attributes {dimension_semantics = [#tpu.dimension_semantics<core_parallel>], iteration_bounds = array<i64: 2>, tpu.core_type = #tpu.core_type<sc_scalar_subcore>, window_params = []} {
    return
  }
}

module attributes {stable_mosaic.version = 11 : i64} {
  func.func private @main(%arg0: i32) attributes {dimension_semantics = [#tpu.dimension_semantics<core_parallel>], iteration_bounds = array<i64: 2>, tpu.core_type = #tpu.core_type<sc_scalar_subcore>, window_params = []} {
    return
  }
}

module attributes {stable_mosaic.version = 11 : i64} {
  func.func @_resident_kernel(%arg0: memref<128x128xbf16, #tpu.memory_space<vmem>>, %arg1: memref<128x128xf32, #tpu.memory_space<vmem>>, %arg2: memref<2x384x128xbf16, #tpu.memory_space<vmem>>, %arg3: memref<128x256xbf16, #tpu.memory_space<vmem>>, %arg4: memref<1x256xf32, #tpu.memory_space<vmem>>, %arg5: memref<256x128xbf16, #tpu.memory_space<vmem>>, %arg6: memref<1x128xf32, #tpu.memory_space<vmem>>, %arg7: memref<128x128xf32, #tpu.memory_space<vmem>>) attributes {dimension_semantics = [], scalar_prefetch = 0 : i64, scratch_operands = 0 : i64, tpu.core_type = #tpu.core_type<tc>} {
    %c0 = arith.constant 0 : index
    %c0_0 = arith.constant 0 : index
    %0 = vector.load %arg0[%c0, %c0_0] : memref<128x128xbf16, #tpu.memory_space<vmem>>, vector<128x128xbf16>
    %c0_1 = arith.constant 0 : index
    %c0_2 = arith.constant 0 : index
    %1 = vector.load %arg1[%c0_1, %c0_2] : memref<128x128xf32, #tpu.memory_space<vmem>>, vector<128x128xf32>
    %2 = arith.truncf %1 : vector<128x128xf32> to vector<128x128xbf16>
    %cst = arith.constant dense<0.000000e+00> : vector<128x128xf32>
    %3 = tpu.matmul %0, %2, %cst {dimension_numbers = #tpu.dot_dimension_numbers<[1], [0], [0], [1], [0, 0, 1, 1], [], []>} : vector<128x128xbf16>, vector<128x128xbf16>, vector<128x128xf32> -> vector<128x128xf32>
    %4 = arith.truncf %3 : vector<128x128xf32> to vector<128x128xbf16>
    %cst_3 = arith.constant dense<0.000000e+00> : vector<128x128xf32>
    %5 = tpu.matmul %0, %4, %cst_3 {dimension_numbers = #tpu.dot_dimension_numbers<[1], [0], [0], [1], [0, 0, 1, 1], [], []>} : vector<128x128xbf16>, vector<128x128xbf16>, vector<128x128xf32> -> vector<128x128xf32>
    %cst_4 = arith.constant 2.000000e+00 : f32
    %6 = vector.broadcast %cst_4 : f32 to vector<128x128xf32>
    %7 = arith.mulf %6, %5 : vector<128x128xf32>
    %8 = arith.subf %7, %1 : vector<128x128xf32>
    %c0_5 = arith.constant 0 : index
    %c0_6 = arith.constant 0 : index
    %c0_7 = arith.constant 0 : index
    %9 = vector.load %arg2[%c0_5, %c0_6, %c0_7] : memref<2x384x128xbf16, #tpu.memory_space<vmem>>, vector<1x128x128xbf16>
    %10 = vector.shape_cast %9 : vector<1x128x128xbf16> to vector<128x128xbf16>
    %cst_8 = arith.constant dense<0.000000e+00> : vector<128x128xf32>
    %11 = tpu.matmul %2, %10, %cst_8 {dimension_numbers = #tpu.dot_dimension_numbers<[1], [0], [0], [1], [0, 0, 1, 1], [], []>} : vector<128x128xbf16>, vector<128x128xbf16>, vector<128x128xf32> -> vector<128x128xf32>
    %c0_9 = arith.constant 0 : index
    %c128 = arith.constant 128 : index
    %c0_10 = arith.constant 0 : index
    %12 = vector.load %arg2[%c0_9, %c128, %c0_10] : memref<2x384x128xbf16, #tpu.memory_space<vmem>>, vector<1x128x128xbf16>
    %13 = vector.shape_cast %12 : vector<1x128x128xbf16> to vector<128x128xbf16>
    %cst_11 = arith.constant dense<0.000000e+00> : vector<128x128xf32>
    %14 = tpu.matmul %4, %13, %cst_11 {dimension_numbers = #tpu.dot_dimension_numbers<[1], [0], [0], [1], [0, 0, 1, 1], [], []>} : vector<128x128xbf16>, vector<128x128xbf16>, vector<128x128xf32> -> vector<128x128xf32>
    %15 = arith.addf %11, %14 : vector<128x128xf32>
    %16 = arith.truncf %8 : vector<128x128xf32> to vector<128x128xbf16>
    %c0_12 = arith.constant 0 : index
    %c256 = arith.constant 256 : index
    %c0_13 = arith.constant 0 : index
    %17 = vector.load %arg2[%c0_12, %c256, %c0_13] : memref<2x384x128xbf16, #tpu.memory_space<vmem>>, vector<1x128x128xbf16>
    %18 = vector.shape_cast %17 : vector<1x128x128xbf16> to vector<128x128xbf16>
    %cst_14 = arith.constant dense<0.000000e+00> : vector<128x128xf32>
    %19 = tpu.matmul %16, %18, %cst_14 {dimension_numbers = #tpu.dot_dimension_numbers<[1], [0], [0], [1], [0, 0, 1, 1], [], []>} : vector<128x128xbf16>, vector<128x128xbf16>, vector<128x128xf32> -> vector<128x128xf32>
    %20 = arith.addf %15, %19 : vector<128x128xf32>
    %cst_15 = arith.constant 0.000000e+00 : f32
    %21 = vector.broadcast %cst_15 : f32 to vector<128x128xf32>
    %22 = arith.maximumf %20, %21 : vector<128x128xf32>
    %23 = arith.truncf %22 : vector<128x128xf32> to vector<128x128xbf16>
    %cst_16 = arith.constant dense<0.000000e+00> : vector<128x128xf32>
    %24 = tpu.matmul %0, %23, %cst_16 {dimension_numbers = #tpu.dot_dimension_numbers<[1], [0], [0], [1], [0, 0, 1, 1], [], []>} : vector<128x128xbf16>, vector<128x128xbf16>, vector<128x128xf32> -> vector<128x128xf32>
    %25 = arith.truncf %24 : vector<128x128xf32> to vector<128x128xbf16>
    %cst_17 = arith.constant dense<0.000000e+00> : vector<128x128xf32>
    %26 = tpu.matmul %0, %25, %cst_17 {dimension_numbers = #tpu.dot_dimension_numbers<[1], [0], [0], [1], [0, 0, 1, 1], [], []>} : vector<128x128xbf16>, vector<128x128xbf16>, vector<128x128xf32> -> vector<128x128xf32>
    %cst_18 = arith.constant 2.000000e+00 : f32
    %27 = vector.broadcast %cst_18 : f32 to vector<128x128xf32>
    %28 = arith.mulf %27, %26 : vector<128x128xf32>
    %29 = arith.subf %28, %22 : vector<128x128xf32>
    %c1 = arith.constant 1 : index
    %c0_19 = arith.constant 0 : index
    %c0_20 = arith.constant 0 : index
    %30 = vector.load %arg2[%c1, %c0_19, %c0_20] : memref<2x384x128xbf16, #tpu.memory_space<vmem>>, vector<1x128x128xbf16>
    %31 = vector.shape_cast %30 : vector<1x128x128xbf16> to vector<128x128xbf16>
    %cst_21 = arith.constant dense<0.000000e+00> : vector<128x128xf32>
    %32 = tpu.matmul %23, %31, %cst_21 {dimension_numbers = #tpu.dot_dimension_numbers<[1], [0], [0], [1], [0, 0, 1, 1], [], []>} : vector<128x128xbf16>, vector<128x128xbf16>, vector<128x128xf32> -> vector<128x128xf32>
    %c1_22 = arith.constant 1 : index
    %c128_23 = arith.constant 128 : index
    %c0_24 = arith.constant 0 : index
    %33 = vector.load %arg2[%c1_22, %c128_23, %c0_24] : memref<2x384x128xbf16, #tpu.memory_space<vmem>>, vector<1x128x128xbf16>
    %34 = vector.shape_cast %33 : vector<1x128x128xbf16> to vector<128x128xbf16>
    %cst_25 = arith.constant dense<0.000000e+00> : vector<128x128xf32>
    %35 = tpu.matmul %25, %34, %cst_25 {dimension_numbers = #tpu.dot_dimension_numbers<[1], [0], [0], [1], [0, 0, 1, 1], [], []>} : vector<128x128xbf16>, vector<128x128xbf16>, vector<128x128xf32> -> vector<128x128xf32>
    %36 = arith.addf %32, %35 : vector<128x128xf32>
    %37 = arith.truncf %29 : vector<128x128xf32> to vector<128x128xbf16>
    %c1_26 = arith.constant 1 : index
    %c256_27 = arith.constant 256 : index
    %c0_28 = arith.constant 0 : index
    %38 = vector.load %arg2[%c1_26, %c256_27, %c0_28] : memref<2x384x128xbf16, #tpu.memory_space<vmem>>, vector<1x128x128xbf16>
    %39 = vector.shape_cast %38 : vector<1x128x128xbf16> to vector<128x128xbf16>
    %cst_29 = arith.constant dense<0.000000e+00> : vector<128x128xf32>
    %40 = tpu.matmul %37, %39, %cst_29 {dimension_numbers = #tpu.dot_dimension_numbers<[1], [0], [0], [1], [0, 0, 1, 1], [], []>} : vector<128x128xbf16>, vector<128x128xbf16>, vector<128x128xf32> -> vector<128x128xf32>
    %41 = arith.addf %36, %40 : vector<128x128xf32>
    %cst_30 = arith.constant 0.000000e+00 : f32
    %42 = vector.broadcast %cst_30 : f32 to vector<128x128xf32>
    %43 = arith.maximumf %41, %42 : vector<128x128xf32>
    %44 = arith.truncf %43 : vector<128x128xf32> to vector<128x128xbf16>
    %c0_31 = arith.constant 0 : index
    %c0_32 = arith.constant 0 : index
    %45 = vector.load %arg3[%c0_31, %c0_32] : memref<128x256xbf16, #tpu.memory_space<vmem>>, vector<128x256xbf16>
    %cst_33 = arith.constant dense<0.000000e+00> : vector<128x256xf32>
    %46 = tpu.matmul %44, %45, %cst_33 {dimension_numbers = #tpu.dot_dimension_numbers<[1], [0], [0], [1], [0, 0, 1, 1], [], []>} : vector<128x128xbf16>, vector<128x256xbf16>, vector<128x256xf32> -> vector<128x256xf32>
    %c0_34 = arith.constant 0 : index
    %c0_35 = arith.constant 0 : index
    %47 = vector.load %arg4[%c0_34, %c0_35] : memref<1x256xf32, #tpu.memory_space<vmem>>, vector<1x256xf32>
    %48 = vector.broadcast %47 : vector<1x256xf32> to vector<128x256xf32>
    %49 = arith.addf %46, %48 : vector<128x256xf32>
    %cst_36 = arith.constant 0.000000e+00 : f32
    %50 = vector.broadcast %cst_36 : f32 to vector<128x256xf32>
    %51 = arith.maximumf %49, %50 : vector<128x256xf32>
    %52 = arith.truncf %51 : vector<128x256xf32> to vector<128x256xbf16>
    %c0_37 = arith.constant 0 : index
    %c0_38 = arith.constant 0 : index
    %53 = vector.load %arg5[%c0_37, %c0_38] : memref<256x128xbf16, #tpu.memory_space<vmem>>, vector<256x128xbf16>
    %cst_39 = arith.constant dense<0.000000e+00> : vector<128x128xf32>
    %54 = tpu.matmul %52, %53, %cst_39 {dimension_numbers = #tpu.dot_dimension_numbers<[1], [0], [0], [1], [0, 0, 1, 1], [], []>} : vector<128x256xbf16>, vector<256x128xbf16>, vector<128x128xf32> -> vector<128x128xf32>
    %c0_40 = arith.constant 0 : index
    %c0_41 = arith.constant 0 : index
    %55 = vector.load %arg6[%c0_40, %c0_41] : memref<1x128xf32, #tpu.memory_space<vmem>>, vector<1x128xf32>
    %56 = vector.broadcast %55 : vector<1x128xf32> to vector<128x128xf32>
    %57 = arith.addf %54, %56 : vector<128x128xf32>
    %c0_42 = arith.constant 0 : index
    %c0_43 = arith.constant 0 : index
    %58 = vector.load %arg7[%c0_42, %c0_43] : memref<128x128xf32, #tpu.memory_space<vmem>>, vector<128x128xf32>
    tpu.vector_store %arg7[%c0_42, %c0_43], %57 {strides = array<i32>} : memref<128x128xf32, #tpu.memory_space<vmem>>, vector<128x128xf32>,
    return
  }
}

</mosaic_0001>

<bundles_post_ra>
// kernel: gcn_forward.1
= control target key start
LH: loop header
LB: loop body
LE: loop exit
PB: predicated region body
PF: predicated region fallthrough
CT: control target
= control target key end

     0   :  { %s3793_s1 = inlined_call_operand.vmem [shape: f32[128,128], index: 1, kind: input, shape index: {}]   ;;  %s3794_s0 = inlined_call_operand.vmem [shape: bf16[128,128], index: 0, kind: input, shape index: {}]   ;;  %s3795_s2 = inlined_call_operand.vmem [shape: bf16[2,384,128], index: 2, kind: input, shape index: {}]   ;;  %s3796_s3 = inlined_call_operand.vmem [shape: bf16[128,256], index: 3, kind: input, shape index: {}]   ;;  %s3797_s5 = inlined_call_operand.vmem [shape: bf16[256,128], index: 5, kind: input, shape index: {}]   ;;  %s3798_s4 = inlined_call_operand.vmem [shape: f32[1,256], index: 4, kind: input, shape index: {}]   ;;  %s3799_s6 = inlined_call_operand.vmem [shape: f32[1,128], index: 6, kind: input, shape index: {}]   ;;  %s3800_s7 = inlined_call_operand.vmem [shape: f32[128,128], index: 7, kind: output, shape index: {}]  }
   0x1   :  { %v2989_v0 = vld [vmem:[%s3793_s1 + $0x70] sm:$0xff]  ;;  %v2994_v1 = vld [vmem:[%s3793_s1 + $0x78] sm:$0xff]  ;;  %v2999_v2 = vld [vmem:[%s3793_s1 + $0x60] sm:$0xff] }
   0x2   :  { %v3003_v3 = vpack.c.bf16 %v2994_v1, %v2989_v0  ;;  %v3008_v4 = vld [vmem:[%s3793_s1 + $0x68] sm:$0xff]  ;;  %v3017_v6 = vld [vmem:[%s3793_s1 + $0x50] sm:$0xff]  ;;  %v3022_v7 = vld [vmem:[%s3793_s1 + $0x58] sm:$0xff] }
   0x3   :  { %v3012_v5 = vpack.c.bf16 %v3008_v4, %v2999_v2  ;;  %v3029_v8 = vld [vmem:[%s3793_s1 + $0x40] sm:$0xff]  ;;  %v3034_v9 = vpack.c.bf16 %v3022_v7, %v3017_v6  ;;  %v3039_v10 = vld [vmem:[%s3793_s1 + $0x48] sm:$0xff]  ;;  %v3056_v13 = vld [vmem:[%s3793_s1 + $0x30] sm:$0xff] }
   0x4   :  { %2528 = vmatprep.subr.bf16.mxu0 %v3003_v3  ;;  %v3044_v11 = vld [vmem:[%s3794_s0] sm:$0xff]   ;;  %v3051_v12 = vpack.c.bf16 %v3039_v10, %v3029_v8  ;;  %v3062_v14 = vld [vmem:[%s3793_s1 + $0x38] sm:$0xff]  ;;  %v3078_v17 = vld [vmem:[%s3793_s1 + $0x28] sm:$0xff] }
   0x5   :  { %2529 = vmatpush3.bf16.msra.mxu0 %v3003_v3  ;;  %2544 = vmatprep.mubr.bf16.mxu0 %v3044_v11  ;;  %v3068_v15 = vpack.c.bf16 %v3062_v14, %v3056_v13  ;;  %v3073_v16 = vld [vmem:[%s3793_s1 + $0x20] sm:$0xff]  ;;  %v3089_v19 = vld [vmem:[%s3793_s1 + $0x10] sm:$0xff]  ;;  %v3094_v20 = vld [vmem:[%s3793_s1 + $0x18] sm:$0xff] }
   0x6   :  { %2530 = vmatprep.subr.bf16.mxu0 %v3012_v5  ;;  %2576 = vmatprep.mubr.bf16.mxu1 %v3044_v11  ;;  %v3084_v18 = vpack.c.bf16 %v3078_v17, %v3073_v16  ;;  %v3100_v21 = vld [vmem:[%s3793_s1] sm:$0xff]  ;;  %v3105_v22 = vld [vmem:[%s3793_s1 + $0x8] sm:$0xff]  ;;  %v3110_v23 = vpack.c.bf16 %v3094_v20, %v3089_v19  ;;  %v2857_v25 = vld [vmem:[%s3795_s2 + $0x78] sm:$0xff]  }
   0x7   :  { %v3116_v24 = vpack.c.bf16 %v3105_v22, %v3100_v21  ;;  %v3126_v26 = vld [vmem:[%s3794_s0 + $0x8] sm:$0xff]   ;;  %v3131_v27 = vld [vmem:[%s3794_s0 + $0x10] sm:$0xff]   ;;  %v3145_v30 = vld [vmem:[%s3794_s0 + $0x18] sm:$0xff]  }
   0x8   :  { %v2858_v28 = vld [vmem:[%s3795_s2 + $0x70] sm:$0xff]   ;;  %v2859_v29 = vld [vmem:[%s3795_s2 + $0x68] sm:$0xff]   ;;  %v3150_v31 = vld [vmem:[%s3794_s0 + $0x20] sm:$0xff]  }
   0x9   :  { %2531 = vmatpush3.bf16.msra.mxu0 %v3012_v5  ;;  %v2860_v32 = vld [vmem:[%s3795_s2 + $0x60] sm:$0xff]   ;;  %v2861_v33 = vld [vmem:[%s3795_s2 + $0x58] sm:$0xff]   ;;  %v3163_v34 = vld [vmem:[%s3794_s0 + $0x28] sm:$0xff]  }
   0xa   :  { %2532 = vmatprep.subr.bf16.mxu0 %v3034_v9  ;;  %v3168_v35 = vld [vmem:[%s3794_s0 + $0x30] sm:$0xff]   ;;  %v3178_v37 = vld [vmem:[%s3794_s0 + $0x38] sm:$0xff]   ;;  %v2863_v38 = vld [vmem:[%s3795_s2 + $0x48] sm:$0xff]  }
   0xb   :  { %3808 = vst [vmem:[#allocation2_spill] sm:$0xff] %v3168_v35  ;;  %v2862_v36 = vld [vmem:[%s3795_s2 + $0x50] sm:$0xff]   ;;  %3809 = vst [vmem:[#allocation3_spill] sm:$0xff] %v3178_v37  ;;  %v2864_v39 = vld [vmem:[%s3795_s2 + $0x40] sm:$0xff]  }
   0xd   :  { %2533 = vmatpush3.bf16.msra.mxu0 %v3034_v9 }
   0xe   :  { %2534 = vmatprep.subr.bf16.mxu0 %v3051_v12 }
  0x11   :  { %2535 = vmatpush3.bf16.msra.mxu0 %v3051_v12 }
  0x12   :  { %2536 = vmatprep.subr.bf16.mxu0 %v3068_v15 }
  0x15   :  { %2537 = vmatpush3.bf16.msra.mxu0 %v3068_v15 }
  0x16   :  { %2538 = vmatprep.subr.bf16.mxu0 %v3084_v18 }
  0x19   :  { %2539 = vmatpush3.bf16.msra.mxu0 %v3084_v18 }
  0x1a   :  { %2540 = vmatprep.subr.bf16.mxu0 %v3110_v23 }
  0x1d   :  { %2541 = vmatpush3.bf16.msra.mxu0 %v3110_v23 }
  0x1e   :  { %2542 = vmatprep.subr.bf16.mxu0 %v3116_v24 }
  0x21   :  { %2543 = vmatpush3.bf16.msra.mxu0 %v3116_v24 }
  0x22   :  { %2592 = vmatprep.subr.bf16.mxu0 %v2857_v25 }
  0x24   :  { %2545 = vmatmul.mubr.bf16.vlgmr.msra.gmra.mxu0 %v3126_v26 }
  0x25   :  { %2548 = vmatprep.mubr.bf16.mxu0 %v3131_v27  ;;  %2593 = vmatpush3.bf16.msra.mxu0 %v2857_v25  ;;  %v2865_v25 = vld [vmem:[%s3795_s2 + $0x38] sm:$0xff]  }
  0x26   :  { %2594 = vmatprep.subr.bf16.mxu0 %v2858_v28 }
  0x29   :  { %2595 = vmatpush3.bf16.msra.mxu0 %v2858_v28  ;;  %v2866_v28 = vld [vmem:[%s3795_s2 + $0x30] sm:$0xff]  }
  0x2a   :  { %2596 = vmatprep.subr.bf16.mxu0 %v2859_v29 }
  0x2c   :  { %2549 = vmatmul.mubr.bf16.gmra.mxu0 %v3145_v30 }
  0x2d   :  { %2552 = vmatprep.mubr.bf16.mxu0 %v3150_v31  ;;  %2597 = vmatpush3.bf16.msra.mxu0 %v2859_v29  ;;  %v2867_v29 = vld [vmem:[%s3795_s2 + $0x28] sm:$0xff]  }
  0x2e   :  { %2598 = vmatprep.subr.bf16.mxu0 %v2860_v32 }
  0x31   :  { %2599 = vmatpush3.bf16.msra.mxu0 %v2860_v32  ;;  %v2868_v32 = vld [vmem:[%s3795_s2 + $0x20] sm:$0xff]  }
  0x32   :  { %2600 = vmatprep.subr.bf16.mxu0 %v2861_v33 }
  0x34   :  { %2553 = vmatmul.mubr.bf16.gmra.mxu0 %v3163_v34 }
  0x35   :  { %2556 = vmatprep.mubr.bf16.mxu0 %v3168_v35  ;;  %2601 = vmatpush3.bf16.msra.mxu0 %v2861_v33  ;;  %v2869_v33 = vld [vmem:[%s3795_s2 + $0x18] sm:$0xff]  }
  0x36   :  { %2602 = vmatprep.subr.bf16.mxu0 %v2862_v36 }
  0x39   :  { %2603 = vmatpush3.bf16.msra.mxu0 %v2862_v36  ;;  %v2870_v36 = vld [vmem:[%s3795_s2 + $0x10] sm:$0xff]  }
  0x3a   :  { %2604 = vmatprep.subr.bf16.mxu0 %v2863_v38 }
  0x3c   :  { %2557 = vmatmul.mubr.bf16.gmra.mxu0 %v3178_v37 }
  0x3d   :  { %2605 = vmatpush3.bf16.msra.mxu0 %v2863_v38  ;;  %v2871_v38 = vld [vmem:[%s3795_s2 + $0x8] sm:$0xff]  }
  0x3e   :  { %2606 = vmatprep.subr.bf16.mxu0 %v2864_v39 }
  0x41   :  { %2607 = vmatpush3.bf16.msra.mxu0 %v2864_v39  ;;  %v2872_v39 = vld [vmem:[%s3795_s2] sm:$0xff]  }
  0xe4   :  { %v2546_v40 = vpop.f32.mrf.mxu0 }
  0xe6   :  { %v149_v41 = vpop.f32.mrf.mxu0 }
  0xe8   :  { %v2547_v42 = vpop.f32.mrf.mxu0 }
  0xe9   :  { %v213_v45 = vpack.c.bf16 %v2547_v42, %v2546_v40  ;;  %v2873_v40 = vld [vmem:[%s3795_s2 + $0xb8] sm:$0xff]  }
  0xea   :  { %v152_v43 = vpop.f32.mrf.mxu0  ;;  %2656 = vmatprep.subr.bf16.mxu0 %v2873_v40 }
  0xeb   :  { %v212_v44 = vpack.c.bf16 %v152_v43, %v149_v41  ;;  %v2874_v41 = vld [vmem:[%s3795_s2 + $0xb0] sm:$0xff]  }
  0xec   :  { %v2550_v46 = vpop.f32.mrf.mxu0 }
  0xed   :  { %2608 = vmatprep.mubr.bf16.mxu0 %v212_v44 }
  0xee   :  { %v165_v47 = vpop.f32.mrf.mxu0  ;;  %2609 = vmatmul.mubr.bf16.vlgmr.msra.gmra.mxu0 %v213_v45 }
  0xef   :  { %2657 = vmatpush3.bf16.msra.mxu0 %v2873_v40 }
  0xf0   :  { %v2551_v48 = vpop.f32.mrf.mxu0  ;;  %2658 = vmatprep.subr.bf16.mxu0 %v2874_v41 }
  0xf1   :  { %v215_v51 = vpack.c.bf16 %v2551_v48, %v2550_v46 }
  0xf2   :  { %v168_v49 = vpop.f32.mrf.mxu0 }
  0xf3   :  { %v214_v50 = vpack.c.bf16 %v168_v49, %v165_v47  ;;  %2659 = vmatpush3.bf16.msra.mxu0 %v2874_v41 }
  0xf4   :  { %v2554_v52 = vpop.f32.mrf.mxu0 }
  0xf5   :  { %2612 = vmatprep.mubr.bf16.mxu0 %v214_v50 }
  0xf6   :  { %v181_v53 = vpop.f32.mrf.mxu0  ;;  %2613 = vmatmul.mubr.bf16.gmra.mxu0 %v215_v51 }
  0xf8   :  { %v2555_v54 = vpop.f32.mrf.mxu0 }
  0xf9   :  { %v217_v57 = vpack.c.bf16 %v2555_v54, %v2554_v52 }
  0xfa   :  { %v184_v55 = vpop.f32.mrf.mxu0 }
  0xfb   :  { %v216_v56 = vpack.c.bf16 %v184_v55, %v181_v53 }
  0xfc   :  { %v2558_v58 = vpop.f32.mrf.mxu0 }
  0xfd   :  { %2616 = vmatprep.mubr.bf16.mxu0 %v216_v56 }
  0xfe   :  { %v197_v59 = vpop.f32.mrf.mxu0  ;;  %2617 = vmatmul.mubr.bf16.gmra.mxu0 %v217_v57 }
 0x100   :  { %v2559_v60 = vpop.f32.mrf.mxu0 }
 0x101   :  { %v219_v61 = vpack.c.bf16 %v2559_v60, %v2558_v58 }
 0x102   :  { %v200_v62 = vpop.f32.mrf.mxu0 }
 0x103   :  { %v218_v63 = vpack.c.bf16 %v200_v62, %v197_v59  ;;  %2560 = vmatprep.subr.bf16.mxu1 %v219_v61 }
 0x104   :  { %2561 = vmatpush3.bf16.msra.mxu1 %v219_v61 }
 0x105   :  { %2562 = vmatprep.subr.bf16.mxu1 %v218_v63  ;;  %2620 = vmatprep.mubr.bf16.mxu0 %v218_v63 }
 0x106   :  { %2621 = vmatmul.mubr.bf16.gmra.mxu0 %v219_v61 }
 0x108   :  { %2563 = vmatpush3.bf16.msra.mxu1 %v218_v63 }
 0x109   :  { %2564 = vmatprep.subr.bf16.mxu1 %v217_v57 }
 0x10c   :  { %2565 = vmatpush3.bf16.msra.mxu1 %v217_v57 }
 0x10d   :  { %2566 = vmatprep.subr.bf16.mxu1 %v216_v56 }
 0x110   :  { %2567 = vmatpush3.bf16.msra.mxu1 %v216_v56 }
 0x111   :  { %2568 = vmatprep.subr.bf16.mxu1 %v215_v51 }
 0x114   :  { %2569 = vmatpush3.bf16.msra.mxu1 %v215_v51 }
 0x115   :  { %2570 = vmatprep.subr.bf16.mxu1 %v214_v50 }
 0x118   :  { %2571 = vmatpush3.bf16.msra.mxu1 %v214_v50 }
 0x119   :  { %2572 = vmatprep.subr.bf16.mxu1 %v213_v45 }
 0x11c   :  { %2573 = vmatpush3.bf16.msra.mxu1 %v213_v45 }
 0x11d   :  { %2574 = vmatprep.subr.bf16.mxu1 %v212_v44 }
 0x120   :  { %2575 = vmatpush3.bf16.msra.mxu1 %v212_v44 }
 0x121   :  { %2624 = vmatprep.subr.bf16.mxu1 %v2865_v25 }
 0x123   :  { %2577 = vmatmul.mubr.bf16.vlgmr.msra.gmra.mxu1 %v3126_v26 }
 0x124   :  { %2625 = vmatpush3.bf16.msra.mxu1 %v2865_v25  ;;  %2580 = vmatprep.mubr.bf16.mxu1 %v3131_v27 }
 0x125   :  { %2626 = vmatprep.subr.bf16.mxu1 %v2866_v28 }
 0x128   :  { %2627 = vmatpush3.bf16.msra.mxu1 %v2866_v28 }
 0x129   :  { %2628 = vmatprep.subr.bf16.mxu1 %v2867_v29 }
 0x12b   :  { %2581 = vmatmul.mubr.bf16.gmra.mxu1 %v3145_v30 }
 0x12c   :  { %2629 = vmatpush3.bf16.msra.mxu1 %v2867_v29  ;;  %2584 = vmatprep.mubr.bf16.mxu1 %v3150_v31 }
 0x12d   :  { %2630 = vmatprep.subr.bf16.mxu1 %v2868_v32 }
 0x130   :  { %2631 = vmatpush3.bf16.msra.mxu1 %v2868_v32 }
 0x131   :  { %2632 = vmatprep.subr.bf16.mxu1 %v2869_v33 }
 0x133   :  { %2585 = vmatmul.mubr.bf16.gmra.mxu1 %v3163_v34 }
 0x134   :  { %2633 = vmatpush3.bf16.msra.mxu1 %v2869_v33  ;;  %2588 = vmatprep.mubr.bf16.mxu1 %v3168_v35 }
 0x135   :  { %2634 = vmatprep.subr.bf16.mxu1 %v2870_v36 }
 0x138   :  { %2635 = vmatpush3.bf16.msra.mxu1 %v2870_v36 }
 0x139   :  { %2636 = vmatprep.subr.bf16.mxu1 %v2871_v38 }
 0x13b   :  { %2589 = vmatmul.mubr.bf16.gmra.mxu1 %v3178_v37 }
 0x13c   :  { %2637 = vmatpush3.bf16.msra.mxu1 %v2871_v38  ;;  %2640 = vmatprep.mubr.bf16.mxu1 %v3116_v24 }
 0x13d   :  { %2638 = vmatprep.subr.bf16.mxu1 %v2872_v39 }
 0x140   :  { %2639 = vmatpush3.bf16.msra.mxu1 %v2872_v39 }
 0x143   :  { %2641 = vmatmul.mubr.bf16.vlgmr.msra.gmra.mxu1 %v3110_v23  ;;  %v2875_v23 = vld [vmem:[%s3795_s2 + $0xa8] sm:$0xff]  }
 0x144   :  { %2644 = vmatprep.mubr.bf16.mxu1 %v3084_v18  ;;  %2660 = vmatprep.subr.bf16.mxu0 %v2875_v23 }
 0x145   :  { %2661 = vmatpush3.bf16.msra.mxu0 %v2875_v23 }
 0x14b   :  { %2645 = vmatmul.mubr.bf16.gmra.mxu1 %v3068_v15  ;;  %v2877_v15 = vld [vmem:[%s3795_s2 + $0x98] sm:$0xff]  }
 0x14c   :  { %2648 = vmatprep.mubr.bf16.mxu1 %v3051_v12  ;;  %v2876_v12 = vld [vmem:[%s3795_s2 + $0xa0] sm:$0xff]  }
 0x14d   :  { %2662 = vmatprep.subr.bf16.mxu0 %v2876_v12 }
 0x14e   :  { %2663 = vmatpush3.bf16.msra.mxu0 %v2876_v12 }
 0x14f   :  { %2664 = vmatprep.subr.bf16.mxu0 %v2877_v15 }
 0x152   :  { %2665 = vmatpush3.bf16.msra.mxu0 %v2877_v15 }
 0x153   :  { %2649 = vmatmul.mubr.bf16.gmra.mxu1 %v3034_v9  ;;  %v2879_v9 = vld [vmem:[%s3795_s2 + $0x88] sm:$0xff]  }
 0x154   :  { %2652 = vmatprep.mubr.bf16.mxu1 %v3012_v5  ;;  %v2878_v5 = vld [vmem:[%s3795_s2 + $0x90] sm:$0xff]  }
 0x155   :  { %2666 = vmatprep.subr.bf16.mxu0 %v2878_v5 }
 0x156   :  { %2667 = vmatpush3.bf16.msra.mxu0 %v2878_v5 }
 0x157   :  { %2668 = vmatprep.subr.bf16.mxu0 %v2879_v9 }
 0x15a   :  { %2669 = vmatpush3.bf16.msra.mxu0 %v2879_v9 }
 0x15b   :  { %2653 = vmatmul.mubr.bf16.gmra.mxu1 %v3003_v3  ;;  %v2880_v3 = vld [vmem:[%s3795_s2 + $0x80] sm:$0xff]  }
 0x15c   :  { %2704 = vmatprep.mubr.bf16.mxu1 %v3044_v11  ;;  %2670 = vmatprep.subr.bf16.mxu0 %v2880_v3 }
 0x15e   :  { %2671 = vmatpush3.bf16.msra.mxu0 %v2880_v3 }
 0x1e3   :  { %v2578_v18 = vpop.f32.mrf.mxu1 }
 0x1e4   :  { %v319_v45 = vmul.f32 2.0, %v2578_v18 }
 0x1e5   :  { %v254_v24 = vpop.f32.mrf.mxu1 }
 0x1e6   :  { %v317_v43 = vmul.f32 2.0, %v254_v24  ;;  %v335_v52 = vsub.f32 %v319_v45, %v3089_v19 }
 0x1e7   :  { %v2579_v42 = vpop.f32.mrf.mxu1 }
 0x1e8   :  { %v320_v44 = vmul.f32 2.0, %v2579_v42  ;;  %v333_v50 = vsub.f32 %v317_v43, %v3100_v21 }
 0x1e9   :  { %v257_v46 = vpop.f32.mrf.mxu1 }
 0x1ea   :  { %v318_v47 = vmul.f32 2.0, %v257_v46  ;;  %v336_v48 = vsub.f32 %v320_v44, %v3094_v20  ;;  %v3268_v44 = vpop.f32.mrf.mxu0 }
 0x1eb   :  { %v2582_v49 = vpop.f32.mrf.mxu1 }
 0x1ec   :  { %v334_v51 = vsub.f32 %v318_v47, %v3105_v22  ;;  %v672_v55 = vpack.c.bf16 %v336_v48, %v335_v52  ;;  %v323_v59 = vmul.f32 2.0, %v2582_v49  ;;  %v3270_v45 = vpop.f32.mrf.mxu0 }
 0x1ed   :  { %v270_v53 = vpop.f32.mrf.mxu1 }
 0x1ee   :  { %v671_v54 = vpack.c.bf16 %v334_v51, %v333_v50  ;;  %v321_v57 = vmul.f32 2.0, %v270_v53  ;;  %v339_v19 = vsub.f32 %v323_v59, %v3056_v13  ;;  %v3272_v46 = vpop.f32.mrf.mxu0 }
 0x1ef   :  { %v2583_v56 = vpop.f32.mrf.mxu1 }
 0x1f0   :  { %v324_v58 = vmul.f32 2.0, %v2583_v56  ;;  %2672 = vmatprep.mubr.bf16.mxu0 %v671_v54  ;;  %v337_v21 = vsub.f32 %v321_v57, %v3073_v16  ;;  %v3274_v47 = vpop.f32.mrf.mxu0 }
 0x1f1   :  { %v273_v60 = vpop.f32.mrf.mxu1  ;;  %2673 = vmatmul.mubr.bf16.vlgmr.msra.gmra.mxu0 %v672_v55 }
 0x1f2   :  { %v322_v61 = vmul.f32 2.0, %v273_v60  ;;  %v340_v20 = vsub.f32 %v324_v58, %v3062_v14 }
 0x1f3   :  { %v2586_v62 = vpop.f32.mrf.mxu1 }
 0x1f4   :  { %v338_v22 = vsub.f32 %v322_v61, %v3078_v17  ;;  %v674_v29 = vpack.c.bf16 %v340_v20, %v339_v19  ;;  %v327_v36 = vmul.f32 2.0, %v2586_v62 }
 0x1f5   :  { %v286_v63 = vpop.f32.mrf.mxu1 }
 0x1f6   :  { %v673_v25 = vpack.c.bf16 %v338_v22, %v337_v21  ;;  %v325_v32 = vmul.f32 2.0, %v286_v63  ;;  %v343_v13 = vsub.f32 %v327_v36, %v3017_v6 }
 0x1f7   :  { %v2587_v28 = vpop.f32.mrf.mxu1 }
 0x1f8   :  { %v328_v33 = vmul.f32 2.0, %v2587_v28  ;;  %2676 = vmatprep.mubr.bf16.mxu0 %v673_v25  ;;  %v341_v16 = vsub.f32 %v325_v32, %v3029_v8 }
 0x1f9   :  { %v289_v38 = vpop.f32.mrf.mxu1  ;;  %2677 = vmatmul.mubr.bf16.gmra.mxu0 %v674_v29 }
 0x1fa   :  { %v326_v39 = vmul.f32 2.0, %v289_v38  ;;  %v344_v14 = vsub.f32 %v328_v33, %v3022_v7 }
 0x1fb   :  { %v2590_v40 = vpop.f32.mrf.mxu1 }
 0x1fc   :  { %v342_v17 = vsub.f32 %v326_v39, %v3039_v10  ;;  %v676_v15 = vpack.c.bf16 %v344_v14, %v343_v13  ;;  %v331_v3 = vmul.f32 2.0, %v2590_v40 }
 0x1fd   :  { %v302_v41 = vpop.f32.mrf.mxu1 }
 0x1fe   :  { %v675_v23 = vpack.c.bf16 %v342_v17, %v341_v16  ;;  %v329_v5 = vmul.f32 2.0, %v302_v41  ;;  %v347_v10 = vsub.f32 %v331_v3, %v2989_v0 }
 0x1ff   :  { %v2591_v12 = vpop.f32.mrf.mxu1 }
 0x200   :  { %v332_v9 = vmul.f32 2.0, %v2591_v12  ;;  %2680 = vmatprep.mubr.bf16.mxu0 %v675_v23  ;;  %v345_v42 = vsub.f32 %v329_v5, %v2999_v2 }
 0x201   :  { %v305_v18 = vpop.f32.mrf.mxu1  ;;  %2681 = vmatmul.mubr.bf16.gmra.mxu0 %v676_v15 }
 0x202   :  { %v330_v24 = vmul.f32 2.0, %v305_v18  ;;  %v348_v7 = vsub.f32 %v332_v9, %v2994_v1  ;;  %v3276_v1 = vpop.f32.mrf.mxu0 }
 0x203   :  { %v3284_v48 = vpop.f32.mrf.mxu1 }
 0x204   :  { %v346_v8 = vsub.f32 %v330_v24, %v3008_v4  ;;  %v678_v43 = vpack.c.bf16 %v348_v7, %v347_v10  ;;  %v3278_v2 = vpop.f32.mrf.mxu0 }
 0x206   :  { %v677_v6 = vpack.c.bf16 %v346_v8, %v345_v42  ;;  %v3280_v4 = vpop.f32.mrf.mxu0 }
 0x208   :  { %2684 = vmatprep.mubr.bf16.mxu0 %v677_v6  ;;  %v3282_v0 = vpop.f32.mrf.mxu0 }
 0x209   :  { %2685 = vmatmul.mubr.bf16.gmra.mxu0 %v678_v43 }
 0x20a   :  { %2736 = vmatprep.mubr.bf16.mxu0 %v3044_v11  ;;  %v2618_v49 = vpop.f32.mrf.mxu0  ;;  %v3286_v11 = vpop.f32.mrf.mxu1 }
 0x20c   :  { %v495_v50 = vpop.f32.mrf.mxu0  ;;  %v3288_v51 = vpop.f32.mrf.mxu1 }
 0x20e   :  { %v2619_v52 = vpop.f32.mrf.mxu0  ;;  %v3290_v53 = vpop.f32.mrf.mxu1 }
 0x210   :  { %v498_v54 = vpop.f32.mrf.mxu0  ;;  %v2646_v55 = vpop.f32.mrf.mxu1 }
 0x212   :  { %v2622_v56 = vpop.f32.mrf.mxu0  ;;  %v3292_v57 = vpop.f32.mrf.mxu1 }
 0x214   :  { %v511_v58 = vpop.f32.mrf.mxu0  ;;  %v2647_v59 = vpop.f32.mrf.mxu1 }
 0x216   :  { %v2623_v60 = vpop.f32.mrf.mxu0  ;;  %v627_v61 = vpop.f32.mrf.mxu1 }
 0x218   :  { %v514_v20 = vpop.f32.mrf.mxu0  ;;  %v2650_v62 = vpop.f32.mrf.mxu1 }
 0x219   :  { %v649_v6 = vadd.f32 %v2650_v62, %v2618_v49 }
 0x21a   :  { %v640_v22 = vpop.f32.mrf.mxu1 }
 0x21b   :  { %v641_v62 = vadd.f32 %v640_v22, %v495_v50  ;;  %v633_v50 = vadd.f32 %v2646_v55, %v3276_v1  ;;  %v625_v1 = vadd.f32 %v3292_v57, %v3278_v2  ;;  %v617_v2 = vadd.f32 %v3284_v48, %v3268_v44 }
 0x21c   :  { %v2651_v25 = vpop.f32.mrf.mxu1  ;;  %v609_v48 = vadd.f32 %v3286_v11, %v3270_v45 }
 0x21d   :  { %v652_v7 = vadd.f32 %v2651_v25, %v2619_v52 }
 0x21e   :  { %v643_v32 = vpop.f32.mrf.mxu1 }
 0x220   :  { %v2654_v38 = vpop.f32.mrf.mxu1 }
 0x221   :  { %v665_v12 = vadd.f32 %v2654_v38, %v2622_v56 }
 0x222   :  { %v656_v40 = vpop.f32.mrf.mxu1 }
 0x223   :  { %v657_v9 = vadd.f32 %v656_v40, %v511_v58  ;;  %v644_v58 = vadd.f32 %v643_v32, %v498_v54  ;;  %v636_v32 = vadd.f32 %v2647_v59, %v3280_v4  ;;  %v628_v4 = vadd.f32 %v627_v61, %v3282_v0 }
 0x224   :  { %v2655_v13 = vpop.f32.mrf.mxu1  ;;  %v620_v0 = vadd.f32 %v3288_v51, %v3272_v46  ;;  %v612_v51 = vadd.f32 %v3290_v53, %v3274_v47 }
 0x225   :  { %v668_v3 = vadd.f32 %v2655_v13, %v2623_v60 }
 0x226   :  { %v659_v15 = vpop.f32.mrf.mxu1 }
 0x227   :  { %v660_v42 = vadd.f32 %v659_v15, %v514_v20  ;;  %v2881_v15 = vld [vmem:[%s3795_s2 + $0x138] sm:$0xff]  }
 0x2b1   :  { %v3294_v21 = vpop.f32.mrf.mxu0 }
 0x2b3   :  { %v3296_v19 = vpop.f32.mrf.mxu0 }
 0x2b5   :  { %v3298_v63 = vpop.f32.mrf.mxu0 }
 0x2b6   :  { %v3377_v57 = vadd.f32 %v3298_v63, %v620_v0 }
 0x2b7   :  { %v3300_v28 = vpop.f32.mrf.mxu0 }
 0x2b8   :  { %v859_v63 = vmax.f32 %v3377_v57, 0.0 }
 0x2b9   :  { %v2678_v29 = vpop.f32.mrf.mxu0 }
 0x2ba   :  { %v3352_v59 = vadd.f32 %v2678_v29, %v633_v50 }
 0x2bb   :  { %v793_v33 = vpop.f32.mrf.mxu0 }
 0x2bc   :  { %v862_v61 = vmax.f32 %v3352_v59, 0.0  ;;  %v3371_v29 = vadd.f32 %v793_v33, %v625_v1  ;;  %v3390_v33 = vadd.f32 %v3294_v21, %v617_v2  ;;  %v3409_v21 = vadd.f32 %v3296_v19, %v609_v48 }
 0x2bd   :  { %v2679_v36 = vpop.f32.mrf.mxu0 }
 0x2be   :  { %v3341_v22 = vadd.f32 %v2679_v36, %v636_v32  ;;  %v860_v44 = vmax.f32 %v3371_v29, 0.0  ;;  %v858_v53 = vmax.f32 %v3390_v33, 0.0 }
 0x2bf   :  { %v796_v39 = vpop.f32.mrf.mxu0 }
 0x2c0   :  { %v863_v55 = vmax.f32 %v3341_v22, 0.0  ;;  %v3359_v36 = vadd.f32 %v796_v39, %v628_v4  ;;  %v3416_v45 = vpack.c.bf16 %v859_v63, %v858_v53 }
 0x2c1   :  { %v2682_v14 = vpop.f32.mrf.mxu0 }
 0x2c2   :  { %v3314_v60 = vadd.f32 %v2682_v14, %v649_v6  ;;  %v3383_v39 = vpack.c.bf16 %v863_v55, %v862_v61  ;;  %v861_v46 = vmax.f32 %v3359_v36, 0.0  ;;  %v3811_v6 = vld [vmem:[#allocation3_spill] sm:$0xff] }
 0x2c3   :  { %v809_v16 = vpop.f32.mrf.mxu0 }
 0x2c4   :  { %v866_v14 = vmax.f32 %v3314_v60, 0.0  ;;  %v3404_v47 = vpack.c.bf16 %v861_v46, %v860_v44 }
 0x2c5   :  { %v2683_v17 = vpop.f32.mrf.mxu0 }
 0x2c6   :  { %v3308_v37 = vadd.f32 %v2683_v17, %v652_v7  ;;  %v3337_v17 = vadd.f32 %v809_v16, %v641_v62  ;;  %v2886_v7 = vld [vmem:[%s3795_s2 + $0x110] sm:$0xff]  }
 0x2c7   :  { %v812_v41 = vpop.f32.mrf.mxu0 }
 0x2c8   :  { %v867_v25 = vmax.f32 %v3308_v37, 0.0  ;;  %v3325_v40 = vadd.f32 %v812_v41, %v644_v58  ;;  %v864_v16 = vmax.f32 %v3337_v17, 0.0  ;;  %v2888_v58 = vld [vmem:[%s3795_s2 + $0x100] sm:$0xff]  }
 0x2c9   :  { %v2686_v23 = vpop.f32.mrf.mxu0 }
 0x2ca   :  { %v3302_v18 = vadd.f32 %v2686_v23, %v665_v12  ;;  %v3347_v13 = vpack.c.bf16 %v867_v25, %v866_v14  ;;  %v865_v41 = vmax.f32 %v3325_v40, 0.0  ;;  %v3398_v12 = vadd.f32 %v3300_v28, %v612_v51 }
 0x2cb   :  { %v825_v5 = vpop.f32.mrf.mxu0  ;;  %v856_v28 = vmax.f32 %v3409_v21, 0.0 }
 0x2cc   :  { %v3304_v8 = vadd.f32 %v825_v5, %v657_v9  ;;  %v3805_v35 = vmax.f32 %v3302_v18, 0.0  ;;  %v3365_v23 = vpack.c.bf16 %v865_v41, %v864_v16  ;;  %v857_v11 = vmax.f32 %v3398_v12, 0.0  ;;  %v2882_v5 = vld [vmem:[%s3795_s2 + $0x130] sm:$0xff]   ;;  %v2883_v9 = vld [vmem:[%s3795_s2 + $0x128] sm:$0xff]  }
 0x2cd   :  { %v2687_v24 = vpop.f32.mrf.mxu0 }
 0x2ce   :  { %v3306_v10 = vadd.f32 %v2687_v24, %v668_v3  ;;  %v3807_v52 = vmax.f32 %v3304_v8, 0.0  ;;  %v3426_v19 = vpack.c.bf16 %v857_v11, %v856_v28  ;;  %v2884_v3 = vld [vmem:[%s3795_s2 + $0x120] sm:$0xff]   ;;  %v2885_v24 = vld [vmem:[%s3795_s2 + $0x118] sm:$0xff]   ;;  %v3812_v40 = vmax.f32 %v3304_v8, 0.0 }
 0x2cf   :  { %v828_v43 = vpop.f32.mrf.mxu0  ;;  %v2925_v8 = vld [vmem:[%s3796_s3 + $0x14] ss:$8 sps:$4 sm:$0xff]  }
 0x2d0   :  { %v871_v56 = vmax.f32 %v3306_v10, 0.0  ;;  %v3312_v38 = vadd.f32 %v828_v43, %v660_v42  ;;  %v3810_v42 = vld [vmem:[#allocation2_spill] sm:$0xff]  ;;  %v2887_v43 = vld [vmem:[%s3795_s2 + $0x108] sm:$0xff]  }
 0x2d1   :  { %v2920_v10 = vld [vmem:[%s3796_s3 + $0x20] ss:$8 sps:$4 sm:$0xff]  }
 0x2d2   :  { %v3321_v20 = vpack.c.bf16 %v871_v56, %v3805_v35  ;;  %v3806_v49 = vmax.f32 %v3312_v38, 0.0  ;;  %v3813_v60 = vmax.f32 %v3312_v38, 0.0  ;;  %v2926_v38 = vld [vmem:[%s3796_s3] ss:$8 sps:$4 sm:$0xff]  }
 0x2d4   :  { %v3331_v54 = vpack.c.bf16 %v3806_v49, %v3807_v52  ;;  %2688 = vmatprep.subr.bf16.mxu1 %v3321_v20 }
 0x2d5   :  { %2689 = vmatpush3.bf16.msra.mxu1 %v3321_v20 }
 0x2d6   :  { %2690 = vmatprep.subr.bf16.mxu1 %v3331_v54 }
 0x2d9   :  { %2691 = vmatpush3.bf16.msra.mxu1 %v3331_v54 }
 0x2da   :  { %2692 = vmatprep.subr.bf16.mxu1 %v3347_v13 }
 0x2dd   :  { %2693 = vmatpush3.bf16.msra.mxu1 %v3347_v13 }
 0x2de   :  { %2694 = vmatprep.subr.bf16.mxu1 %v3365_v23 }
 0x2e1   :  { %2695 = vmatpush3.bf16.msra.mxu1 %v3365_v23 }
 0x2e2   :  { %2696 = vmatprep.subr.bf16.mxu1 %v3383_v39 }
 0x2e5   :  { %2697 = vmatpush3.bf16.msra.mxu1 %v3383_v39 }
 0x2e6   :  { %2698 = vmatprep.subr.bf16.mxu1 %v3404_v47 }
 0x2e9   :  { %2699 = vmatpush3.bf16.msra.mxu1 %v3404_v47 }
 0x2ea   :  { %2700 = vmatprep.subr.bf16.mxu1 %v3416_v45 }
 0x2ed   :  { %2701 = vmatpush3.bf16.msra.mxu1 %v3416_v45 }
 0x2ee   :  { %2702 = vmatprep.subr.bf16.mxu1 %v3426_v19 }
 0x2f1   :  { %2703 = vmatpush3.bf16.msra.mxu1 %v3426_v19 }
 0x2f2   :  { %2752 = vmatprep.subr.bf16.mxu1 %v2881_v15 }
 0x2f4   :  { %2705 = vmatmul.mubr.bf16.vlgmr.msra.gmra.mxu1 %v3126_v26 }
 0x2f5   :  { %2708 = vmatprep.mubr.bf16.mxu1 %v3131_v27  ;;  %2753 = vmatpush3.bf16.msra.mxu1 %v2881_v15 }
 0x2f6   :  { %2754 = vmatprep.subr.bf16.mxu1 %v2882_v5 }
 0x2f9   :  { %2755 = vmatpush3.bf16.msra.mxu1 %v2882_v5 }
 0x2fa   :  { %2756 = vmatprep.subr.bf16.mxu1 %v2883_v9 }
 0x2fc   :  { %2709 = vmatmul.mubr.bf16.gmra.mxu1 %v3145_v30 }
 0x2fd   :  { %2712 = vmatprep.mubr.bf16.mxu1 %v3150_v31  ;;  %2757 = vmatpush3.bf16.msra.mxu1 %v2883_v9 }
 0x2fe   :  { %2758 = vmatprep.subr.bf16.mxu1 %v2884_v3 }
 0x301   :  { %2759 = vmatpush3.bf16.msra.mxu1 %v2884_v3 }
 0x302   :  { %2760 = vmatprep.subr.bf16.mxu1 %v2885_v24 }
 0x304   :  { %2713 = vmatmul.mubr.bf16.gmra.mxu1 %v3163_v34 }
 0x305   :  { %2716 = vmatprep.mubr.bf16.mxu1 %v3810_v42  ;;  %2761 = vmatpush3.bf16.msra.mxu1 %v2885_v24 }
 0x306   :  { %2762 = vmatprep.subr.bf16.mxu1 %v2886_v7 }
 0x309   :  { %2763 = vmatpush3.bf16.msra.mxu1 %v2886_v7 }
 0x30a   :  { %2764 = vmatprep.subr.bf16.mxu1 %v2887_v43 }
 0x30c   :  { %2717 = vmatmul.mubr.bf16.gmra.mxu1 %v3811_v6 }
 0x30d   :  { %2765 = vmatpush3.bf16.msra.mxu1 %v2887_v43 }
 0x30e   :  { %2766 = vmatprep.subr.bf16.mxu1 %v2888_v58 }
 0x311   :  { %2767 = vmatpush3.bf16.msra.mxu1 %v2888_v58 }
 0x3b4   :  { %v2706_v62 = vpop.f32.mrf.mxu1 }
 0x3b6   :  { %v914_v32 = vpop.f32.mrf.mxu1 }
 0x3b8   :  { %v2707_v50 = vpop.f32.mrf.mxu1 }
 0x3b9   :  { %v978_v0 = vpack.c.bf16 %v2707_v50, %v2706_v62 }
 0x3ba   :  { %v917_v4 = vpop.f32.mrf.mxu1 }
 0x3bb   :  { %v977_v1 = vpack.c.bf16 %v917_v4, %v914_v32 }
 0x3bc   :  { %v2710_v2 = vpop.f32.mrf.mxu1 }
 0x3bd   :  { %2768 = vmatprep.mubr.bf16.mxu1 %v977_v1 }
 0x3be   :  { %v930_v51 = vpop.f32.mrf.mxu1  ;;  %2769 = vmatmul.mubr.bf16.vlgmr.msra.gmra.mxu1 %v978_v0 }
 0x3c0   :  { %v2711_v48 = vpop.f32.mrf.mxu1 }
 0x3c1   :  { %v980_v9 = vpack.c.bf16 %v2711_v48, %v2710_v2  ;;  %v2913_v2 = vld [vmem:[%s3796_s3 + $0x54] ss:$8 sps:$4 sm:$0xff]   ;;  %v2916_v48 = vld [vmem:[%s3796_s3 + $0x44] ss:$8 sps:$4 sm:$0xff]  }
 0x3c2   :  { %v933_v15 = vpop.f32.mrf.mxu1 }
 0x3c3   :  { %v979_v5 = vpack.c.bf16 %v933_v15, %v930_v51  ;;  %v2911_v51 = vld [vmem:[%s3796_s3 + $0x50] ss:$8 sps:$4 sm:$0xff]   ;;  %v2914_v15 = vld [vmem:[%s3796_s3 + $0x40] ss:$8 sps:$4 sm:$0xff]  }
 0x3c4   :  { %v2714_v3 = vpop.f32.mrf.mxu1 }
 0x3c5   :  { %2772 = vmatprep.mubr.bf16.mxu1 %v979_v5 }
 0x3c6   :  { %v946_v24 = vpop.f32.mrf.mxu1  ;;  %2773 = vmatmul.mubr.bf16.gmra.mxu1 %v980_v9 }
 0x3c8   :  { %v2715_v7 = vpop.f32.mrf.mxu1 }
 0x3c9   :  { %v982_v35 = vpack.c.bf16 %v2715_v7, %v2714_v3 }
 0x3ca   :  { %v949_v43 = vpop.f32.mrf.mxu1 }
 0x3cb   :  { %v981_v58 = vpack.c.bf16 %v949_v43, %v946_v24 }
 0x3cc   :  { %v2718_v49 = vpop.f32.mrf.mxu1 }
 0x3cd   :  { %2776 = vmatprep.mubr.bf16.mxu1 %v981_v58 }
 0x3ce   :  { %v962_v32 = vpop.f32.mrf.mxu1  ;;  %2777 = vmatmul.mubr.bf16.gmra.mxu1 %v982_v35 }
 0x3d0   :  { %v2719_v62 = vpop.f32.mrf.mxu1 }
 0x3d1   :  { %v984_v50 = vpack.c.bf16 %v2719_v62, %v2718_v49  ;;  %v2889_v49 = vld [vmem:[%s3795_s2 + $0xf8] sm:$0xff]  }
 0x3d2   :  { %v965_v4 = vpop.f32.mrf.mxu1 }
 0x3d3   :  { %v983_v52 = vpack.c.bf16 %v965_v4, %v962_v32  ;;  %2720 = vmatprep.subr.bf16.mxu0 %v984_v50 }
 0x3d4   :  { %2721 = vmatpush3.bf16.msra.mxu0 %v984_v50 }
 0x3d5   :  { %2722 = vmatprep.subr.bf16.mxu0 %v983_v52  ;;  %2780 = vmatprep.mubr.bf16.mxu1 %v983_v52 }
 0x3d6   :  { %2781 = vmatmul.mubr.bf16.gmra.mxu1 %v984_v50 }
 0x3d8   :  { %2723 = vmatpush3.bf16.msra.mxu0 %v983_v52  ;;  %v2890_v52 = vld [vmem:[%s3795_s2 + $0xf0] sm:$0xff]  }
 0x3d9   :  { %2724 = vmatprep.subr.bf16.mxu0 %v982_v35 }
 0x3dc   :  { %2725 = vmatpush3.bf16.msra.mxu0 %v982_v35  ;;  %v2891_v35 = vld [vmem:[%s3795_s2 + $0xe8] sm:$0xff]  }
 0x3dd   :  { %2726 = vmatprep.subr.bf16.mxu0 %v981_v58 }
 0x3e0   :  { %2727 = vmatpush3.bf16.msra.mxu0 %v981_v58 }
 0x3e1   :  { %2728 = vmatprep.subr.bf16.mxu0 %v980_v9 }
 0x3e4   :  { %2729 = vmatpush3.bf16.msra.mxu0 %v980_v9  ;;  %v2917_v9 = vld [vmem:[%s3796_s3 + $0x30] ss:$8 sps:$4 sm:$0xff]  }
 0x3e5   :  { %2730 = vmatprep.subr.bf16.mxu0 %v979_v5 }
 0x3e8   :  { %2731 = vmatpush3.bf16.msra.mxu0 %v979_v5  ;;  %v2919_v5 = vld [vmem:[%s3796_s3 + $0x34] ss:$8 sps:$4 sm:$0xff]  }
 0x3e9   :  { %2732 = vmatprep.subr.bf16.mxu0 %v978_v0 }
 0x3ec   :  { %2733 = vmatpush3.bf16.msra.mxu0 %v978_v0  ;;  %v2908_v0 = vld [vmem:[%s3796_s3 + $0x60] ss:$8 sps:$4 sm:$0xff]  }
 0x3ed   :  { %2734 = vmatprep.subr.bf16.mxu0 %v977_v1 }
 0x3f0   :  { %2735 = vmatpush3.bf16.msra.mxu0 %v977_v1  ;;  %v2892_v1 = vld [vmem:[%s3795_s2 + $0xe0] sm:$0xff]  }
 0x3f1   :  { %2784 = vmatprep.subr.bf16.mxu0 %v2889_v49 }
 0x3f3   :  { %2737 = vmatmul.mubr.bf16.vlgmr.msra.gmra.mxu0 %v3126_v26  ;;  %v2893_v26 = vld [vmem:[%s3795_s2 + $0xd8] sm:$0xff]  }
 0x3f4   :  { %2785 = vmatpush3.bf16.msra.mxu0 %v2889_v49  ;;  %2740 = vmatprep.mubr.bf16.mxu0 %v3131_v27  ;;  %v2894_v27 = vld [vmem:[%s3795_s2 + $0xd0] sm:$0xff]  }
 0x3f5   :  { %2786 = vmatprep.subr.bf16.mxu0 %v2890_v52 }
 0x3f8   :  { %2787 = vmatpush3.bf16.msra.mxu0 %v2890_v52 }
 0x3f9   :  { %2788 = vmatprep.subr.bf16.mxu0 %v2891_v35 }
 0x3fb   :  { %2741 = vmatmul.mubr.bf16.gmra.mxu0 %v3145_v30  ;;  %v2895_v30 = vld [vmem:[%s3795_s2 + $0xc8] sm:$0xff]  }
 0x3fc   :  { %2789 = vmatpush3.bf16.msra.mxu0 %v2891_v35  ;;  %2744 = vmatprep.mubr.bf16.mxu0 %v3150_v31  ;;  %v2896_v31 = vld [vmem:[%s3795_s2 + $0xc0] sm:$0xff]  }
 0x3fd   :  { %2790 = vmatprep.subr.bf16.mxu0 %v2892_v1 }
 0x400   :  { %2791 = vmatpush3.bf16.msra.mxu0 %v2892_v1 }
 0x401   :  { %2792 = vmatprep.subr.bf16.mxu0 %v2893_v26 }
 0x403   :  { %2745 = vmatmul.mubr.bf16.gmra.mxu0 %v3163_v34  ;;  %v2897_v34 = vld [vmem:[%s3795_s2 + $0x178] sm:$0xff]  }
 0x404   :  { %2793 = vmatpush3.bf16.msra.mxu0 %v2893_v26  ;;  %2748 = vmatprep.mubr.bf16.mxu0 %v3810_v42  ;;  %v2898_v42 = vld [vmem:[%s3795_s2 + $0x170] sm:$0xff]  }
 0x405   :  { %2794 = vmatprep.subr.bf16.mxu0 %v2894_v27  ;;  %2816 = vmatprep.subr.bf16.mxu1 %v2897_v34 }
 0x406   :  { %2817 = vmatpush3.bf16.msra.mxu1 %v2897_v34 }
 0x407   :  { %2818 = vmatprep.subr.bf16.mxu1 %v2898_v42 }
 0x408   :  { %2795 = vmatpush3.bf16.msra.mxu0 %v2894_v27 }
 0x409   :  { %2796 = vmatprep.subr.bf16.mxu0 %v2895_v30 }
 0x40a   :  { %2819 = vmatpush3.bf16.msra.mxu1 %v2898_v42 }
 0x40b   :  { %2749 = vmatmul.mubr.bf16.gmra.mxu0 %v3811_v6  ;;  %v2910_v6 = vld [vmem:[%s3796_s3 + $0x64] ss:$8 sps:$4 sm:$0xff]  }
 0x40c   :  { %2797 = vmatpush3.bf16.msra.mxu0 %v2895_v30  ;;  %2800 = vmatprep.mubr.bf16.mxu0 %v3426_v19  ;;  %v2907_v19 = vld [vmem:[%s3796_s3 + $0x74] ss:$8 sps:$4 sm:$0xff]  }
 0x40d   :  { %2798 = vmatprep.subr.bf16.mxu0 %v2896_v31 }
 0x410   :  { %2799 = vmatpush3.bf16.msra.mxu0 %v2896_v31 }
 0x411   :  { %1754 = vmatprep.subr.bf16.mxu0 %v2907_v19 }
 0x413   :  { %2801 = vmatmul.mubr.bf16.vlgmr.msra.gmra.mxu0 %v3416_v45  ;;  %v2899_v45 = vld [vmem:[%s3795_s2 + $0x168] sm:$0xff]  }
 0x414   :  { %2804 = vmatprep.mubr.bf16.mxu0 %v3404_v47  ;;  %2820 = vmatprep.subr.bf16.mxu1 %v2899_v45  ;;  %v2904_v47 = vld [vmem:[%s3795_s2 + $0x140] sm:$0xff]  }
 0x415   :  { %2821 = vmatpush3.bf16.msra.mxu1 %v2899_v45 }
 0x41b   :  { %2805 = vmatmul.mubr.bf16.gmra.mxu0 %v3383_v39  ;;  %v2901_v39 = vld [vmem:[%s3795_s2 + $0x158] sm:$0xff]  }
 0x41c   :  { %2808 = vmatprep.mubr.bf16.mxu0 %v3365_v23  ;;  %v2900_v23 = vld [vmem:[%s3795_s2 + $0x160] sm:$0xff]  }
 0x41d   :  { %2822 = vmatprep.subr.bf16.mxu1 %v2900_v23 }
 0x41e   :  { %2823 = vmatpush3.bf16.msra.mxu1 %v2900_v23 }
 0x41f   :  { %2824 = vmatprep.subr.bf16.mxu1 %v2901_v39 }
 0x422   :  { %2825 = vmatpush3.bf16.msra.mxu1 %v2901_v39 }
 0x423   :  { %2809 = vmatmul.mubr.bf16.gmra.mxu0 %v3347_v13  ;;  %v2903_v13 = vld [vmem:[%s3795_s2 + $0x148] sm:$0xff]  }
 0x424   :  { %2812 = vmatprep.mubr.bf16.mxu0 %v3331_v54  ;;  %v2902_v54 = vld [vmem:[%s3795_s2 + $0x150] sm:$0xff]  }
 0x425   :  { %2826 = vmatprep.subr.bf16.mxu1 %v2902_v54 }
 0x426   :  { %2827 = vmatpush3.bf16.msra.mxu1 %v2902_v54 }
 0x427   :  { %2828 = vmatprep.subr.bf16.mxu1 %v2903_v13 }
 0x42a   :  { %2829 = vmatpush3.bf16.msra.mxu1 %v2903_v13 }
 0x42b   :  { %2813 = vmatmul.mubr.bf16.gmra.mxu0 %v3321_v20  ;;  %2830 = vmatprep.subr.bf16.mxu1 %v2904_v47  ;;  %v2905_v20 = vld [vmem:[%s3796_s3 + $0x70] ss:$8 sps:$4 sm:$0xff]  }
 0x42c   :  { %1755 = vmatpush1.bf16.msra.mxu0 %v2905_v20 }
 0x42d   :  { %1756 = vmatprep.subr.bf16.mxu0 %v2910_v6 }
 0x42e   :  { %2831 = vmatpush3.bf16.msra.mxu1 %v2904_v47 }
 0x430   :  { %1757 = vmatpush1.bf16.msra.mxu0 %v2908_v0 }
 0x431   :  { %1758 = vmatprep.subr.bf16.mxu0 %v2913_v2 }
 0x434   :  { %1759 = vmatpush1.bf16.msra.mxu0 %v2911_v51 }
 0x435   :  { %1760 = vmatprep.subr.bf16.mxu0 %v2916_v48 }
 0x438   :  { %1761 = vmatpush1.bf16.msra.mxu0 %v2914_v15 }
 0x439   :  { %1762 = vmatprep.subr.bf16.mxu0 %v2919_v5 }
 0x43c   :  { %1763 = vmatpush1.bf16.msra.mxu0 %v2917_v9 }
 0x4b3   :  { %v2738_v3 = vpop.f32.mrf.mxu0 }
 0x4b4   :  { %v1084_v32 = vmul.f32 2.0, %v2738_v3  ;;  %v2922_v3 = vld [vmem:[%s3796_s3 + $0x24] ss:$8 sps:$4 sm:$0xff]  }
 0x4b5   :  { %v1019_v24 = vpop.f32.mrf.mxu0  ;;  %1764 = vmatprep.subr.bf16.mxu0 %v2922_v3 }
 0x4b6   :  { %v1082_v43 = vmul.f32 2.0, %v1019_v24  ;;  %v1100_v1 = vsub.f32 %v1084_v32, %v858_v53  ;;  %1765 = vmatpush1.bf16.msra.mxu0 %v2920_v10  ;;  %v2945_v24 = vmov 0   ;;  %v2930_v32 = vld [vmem:[%s3797_s5 + $0x38] sm:$0xff]  }
 0x4b7   :  { %v2739_v7 = vpop.f32.mrf.mxu0  ;;  %1766 = vmatprep.subr.bf16.mxu0 %v2925_v8  ;;  %1786 = vmatprep.mubr.bf16.mxu0 %v2945_v24 }
 0x4b8   :  { %v1085_v58 = vmul.f32 2.0, %v2739_v7  ;;  %v1098_v52 = vsub.f32 %v1082_v43, %v856_v28  ;;  %v2770_v7 = vpop.f32.mrf.mxu1 }
 0x4b9   :  { %v1022_v62 = vpop.f32.mrf.mxu0 }
 0x4ba   :  { %v1083_v50 = vmul.f32 2.0, %v1022_v62  ;;  %v1101_v4 = vsub.f32 %v1085_v58, %v859_v63  ;;  %v1229_v43 = vpop.f32.mrf.mxu1  ;;  %v2929_v58 = vld [vmem:[%s3797_s5 + $0x78] sm:$0xff]   ;;  %v2931_v62 = vld [vmem:[%s3797_s5 + $0x70] sm:$0xff]  }
 0x4bb   :  { %v2742_v49 = vpop.f32.mrf.mxu0  ;;  %2464 = vmatprep.subr.bf16.mxu1 %v2929_v58 }
 0x4bc   :  { %v1099_v35 = vsub.f32 %v1083_v50, %v857_v11  ;;  %v1438_v30 = vpack.c.bf16 %v1101_v4, %v1100_v1  ;;  %v1088_v45 = vmul.f32 2.0, %v2742_v49  ;;  %v2932_v50 = vld [vmem:[%s3797_s5 + $0x30] sm:$0xff]   ;;  %v2771_v4 = vpop.f32.mrf.mxu1  ;;  %v2933_v49 = vld [vmem:[%s3797_s5 + $0x68] sm:$0xff]   ;;  %v2935_v1 = vld [vmem:[%s3797_s5 + $0x60] sm:$0xff]  }
 0x4bd   :  { %v1035_v26 = vpop.f32.mrf.mxu0 }
 0x4be   :  { %v1437_v27 = vpack.c.bf16 %v1099_v35, %v1098_v52  ;;  %v1086_v34 = vmul.f32 2.0, %v1035_v26  ;;  %v1104_v53 = vsub.f32 %v1088_v45, %v862_v61  ;;  %v2934_v52 = vld [vmem:[%s3797_s5 + $0x28] sm:$0xff]   ;;  %v1232_v35 = vpop.f32.mrf.mxu1  ;;  %v2936_v26 = vld [vmem:[%s3797_s5 + $0x20] sm:$0xff]  }
 0x4bf   :  { %v2743_v31 = vpop.f32.mrf.mxu0 }
 0x4c0   :  { %v1089_v42 = vmul.f32 2.0, %v2743_v31  ;;  %2832 = vmatprep.mubr.bf16.mxu1 %v1437_v27  ;;  %v1102_v12 = vsub.f32 %v1086_v34, %v860_v44  ;;  %v2937_v27 = vld [vmem:[%s3797_s5 + $0x58] sm:$0xff]  }
 0x4c1   :  { %v1038_v57 = vpop.f32.mrf.mxu0  ;;  %2833 = vmatmul.mubr.bf16.vlgmr.msra.gmra.mxu1 %v1438_v30  ;;  %v3633_v30 = vpop.f32.mrf.mxu1  ;;  %v2938_v31 = vld [vmem:[%s3797_s5 + $0x18] sm:$0xff]  }
 0x4c2   :  { %v1087_v63 = vmul.f32 2.0, %v1038_v57  ;;  %v1105_v21 = vsub.f32 %v1089_v42, %v863_v55  ;;  %2465 = vmatpush3.bf16.msra.mxu1 %v2930_v32 }
 0x4c3   :  { %v2746_v28 = vpop.f32.mrf.mxu0  ;;  %2466 = vmatprep.subr.bf16.mxu1 %v2931_v62  ;;  %v1245_v34 = vpop.f32.mrf.mxu1 }
 0x4c4   :  { %v1103_v33 = vsub.f32 %v1087_v63, %v861_v46  ;;  %v1440_v54 = vpack.c.bf16 %v1105_v21, %v1104_v53  ;;  %v1092_v20 = vmul.f32 2.0, %v2746_v28 }
 0x4c5   :  { %v1051_v11 = vpop.f32.mrf.mxu0  ;;  %v2775_v42 = vpop.f32.mrf.mxu1 }
 0x4c6   :  { %v1439_v23 = vpack.c.bf16 %v1103_v33, %v1102_v12  ;;  %v1090_v13 = vmul.f32 2.0, %v1051_v11  ;;  %v1108_v61 = vsub.f32 %v1092_v20, %v866_v14  ;;  %2467 = vmatpush3.bf16.msra.mxu1 %v2932_v50 }
 0x4c7   :  { %v2747_v39 = vpop.f32.mrf.mxu0  ;;  %2468 = vmatprep.subr.bf16.mxu1 %v2933_v49  ;;  %v1248_v45 = vpop.f32.mrf.mxu1 }
 0x4c8   :  { %v1093_v47 = vmul.f32 2.0, %v2747_v39  ;;  %2836 = vmatprep.mubr.bf16.mxu1 %v1439_v23  ;;  %v1106_v36 = vsub.f32 %v1090_v13, %v864_v16  ;;  %v3814_v16 = vmax.f32 %v3302_v18, 0.0  ;;  %v2923_v18 = vld [vmem:[%s3796_s3 + $0x10] ss:$8 sps:$4 sm:$0xff]  }
 0x4c9   :  { %v1054_v22 = vpop.f32.mrf.mxu0  ;;  %2837 = vmatmul.mubr.bf16.gmra.mxu1 %v1440_v54  ;;  %1767 = vmatpush1.bf16.msra.mxu0 %v2923_v18  ;;  %v3638_v57 = vpop.f32.mrf.mxu1 }
 0x4ca   :  { %v1091_v55 = vmul.f32 2.0, %v1054_v22  ;;  %v1109_v29 = vsub.f32 %v1093_v47, %v867_v25  ;;  %2469 = vmatpush3.bf16.msra.mxu1 %v2934_v52 }
 0x4cb   :  { %v2750_v44 = vpop.f32.mrf.mxu0  ;;  %2470 = vmatprep.subr.bf16.mxu1 %v2935_v1  ;;  %v3640_v63 = vpop.f32.mrf.mxu1 }
 0x4cc   :  { %v1107_v59 = vsub.f32 %v1091_v55, %v865_v41  ;;  %v1442_v0 = vpack.c.bf16 %v1109_v29, %v1108_v61  ;;  %v1096_v48 = vmul.f32 2.0, %v2750_v44 }
 0x4cd   :  { %v1067_v46 = vpop.f32.mrf.mxu0  ;;  %v3642_v21 = vpop.f32.mrf.mxu1 }
 0x4ce   :  { %v1441_v19 = vpack.c.bf16 %v1107_v59, %v1106_v36  ;;  %v1094_v2 = vmul.f32 2.0, %v1067_v46  ;;  %v1112_v15 = vsub.f32 %v1096_v48, %v3814_v16  ;;  %2471 = vmatpush3.bf16.msra.mxu1 %v2936_v26 }
 0x4cf   :  { %v2751_v6 = vpop.f32.mrf.mxu0  ;;  %2472 = vmatprep.subr.bf16.mxu1 %v2937_v27  ;;  %v1264_v28 = vpop.f32.mrf.mxu1 }
 0x4d0   :  { %v1097_v51 = vmul.f32 2.0, %v2751_v6  ;;  %2840 = vmatprep.mubr.bf16.mxu1 %v1441_v19  ;;  %v1110_v41 = vsub.f32 %v1094_v2, %v3812_v40 }
 0x4d1   :  { %v1070_v37 = vpop.f32.mrf.mxu0  ;;  %2841 = vmatmul.mubr.bf16.gmra.mxu1 %v1442_v0  ;;  %v3644_v12 = vpop.f32.mrf.mxu1 }
 0x4d2   :  { %v1095_v25 = vmul.f32 2.0, %v1070_v37  ;;  %v1113_v17 = vsub.f32 %v1097_v51, %v871_v56  ;;  %v2928_v56 = vld [vmem:[%s3796_s3 + $0x4] ss:$8 sps:$4 sm:$0xff]   ;;  %2473 = vmatpush3.bf16.msra.mxu1 %v2938_v31 }
 0x4d3   :  { %1768 = vmatprep.subr.bf16.mxu0 %v2928_v56  ;;  %v2802_v33 = vpop.f32.mrf.mxu0  ;;  %v3646_v53 = vpop.f32.mrf.mxu1 }
 0x4d4   :  { %v1111_v14 = vsub.f32 %v1095_v25, %v3813_v60  ;;  %v1444_v9 = vpack.c.bf16 %v1113_v17, %v1112_v15  ;;  %1769 = vmatpush1.bf16.msra.mxu0 %v2926_v38  ;;  %v1383_v37 = vadd.f32 %v2802_v33, %v2770_v7 }
 0x4d5   :  { %v1374_v11 = vpop.f32.mrf.mxu0  ;;  %v3648_v23 = vpop.f32.mrf.mxu1 }
 0x4d6   :  { %v1443_v5 = vpack.c.bf16 %v1111_v14, %v1110_v41  ;;  %v1375_v55 = vadd.f32 %v1374_v11, %v1229_v43 }
 0x4d7   :  { %v2803_v39 = vpop.f32.mrf.mxu0  ;;  %v3650_v54 = vpop.f32.mrf.mxu1 }
 0x4d8   :  { %2844 = vmatprep.mubr.bf16.mxu1 %v1443_v5  ;;  %v1386_v6 = vadd.f32 %v2803_v39, %v2771_v4 }
 0x4d9   :  { %2845 = vmatmul.mubr.bf16.gmra.mxu1 %v1444_v9  ;;  %v1377_v13 = vpop.f32.mrf.mxu0 }
 0x4da   :  { %v1378_v44 = vadd.f32 %v1377_v13, %v1232_v35 }
 0x4db   :  { %v2806_v20 = vpop.f32.mrf.mxu0 }
 0x4dc   :  { %v1399_v50 = vadd.f32 %v2806_v20, %v3633_v30 }
 0x4dd   :  { %v1390_v59 = vpop.f32.mrf.mxu0 }
 0x4de   :  { %v1391_v3 = vadd.f32 %v1390_v59, %v1245_v34 }
 0x4df   :  { %v2807_v51 = vpop.f32.mrf.mxu0 }
 0x4e0   :  { %v1402_v58 = vadd.f32 %v2807_v51, %v2775_v42 }
 0x4e1   :  { %v1393_v60 = vpop.f32.mrf.mxu0 }
 0x4e2   :  { %v1394_v15 = vadd.f32 %v1393_v60, %v1248_v45 }
 0x4e3   :  { %v2810_v9 = vpop.f32.mrf.mxu0 }
 0x4e5   :  { %v1406_v38 = vpop.f32.mrf.mxu0 }
 0x4e6   :  { %v1407_v33 = vadd.f32 %v1406_v38, %v3640_v63 }
 0x4e7   :  { %v2811_v62 = vpop.f32.mrf.mxu0 }
 0x4e9   :  { %v1409_v1 = vpop.f32.mrf.mxu0 }
 0x4ea   :  { %v1410_v31 = vadd.f32 %v1409_v1, %v1264_v28  ;;  %v1415_v28 = vadd.f32 %v2810_v9, %v3638_v57  ;;  %v1664_v9 = vlaneseq }
 0x4eb   :  { %v2814_v45 = vpop.f32.mrf.mxu0 }
 0x4ed   :  { %v1422_v30 = vpop.f32.mrf.mxu0 }
 0x581   :  { %v2834_v47 = vpop.f32.mrf.mxu1 }
 0x582   :  { %v1608_v41 = vadd.f32 %v2834_v47, %v1383_v37 }
 0x583   :  { %v1543_v22 = vpop.f32.mrf.mxu1 }
 0x584   :  { %v1606_v36 = vadd.f32 %v1543_v22, %v1375_v55  ;;  %v1624_v5 = vmax.f32 %v1608_v41, 0.0  ;;  %v1418_v22 = vadd.f32 %v2811_v62, %v3642_v21 }
 0x585   :  { %v2835_v29 = vpop.f32.mrf.mxu1 }
 0x586   :  { %v1622_v0 = vmax.f32 %v1606_v36, 0.0  ;;  %v1609_v25 = vadd.f32 %v2835_v29, %v1386_v6  ;;  %v2815_v29 = vpop.f32.mrf.mxu0 }
 0x587   :  { %v1546_v61 = vpop.f32.mrf.mxu1  ;;  %v1434_v37 = vadd.f32 %v2815_v29, %v3648_v23  ;;  %v2940_v23 = vld [vmem:[%s3797_s5 + $0x10] sm:$0xff]  }
 0x588   :  { %v1607_v46 = vadd.f32 %v1546_v61, %v1378_v44  ;;  %v1625_v14 = vmax.f32 %v1609_v25, 0.0  ;;  %v1425_v61 = vpop.f32.mrf.mxu0 }
 0x589   :  { %v2838_v19 = vpop.f32.mrf.mxu1  ;;  %v1426_v6 = vadd.f32 %v1425_v61, %v3650_v54 }
 0x58a   :  { %v1623_v2 = vmax.f32 %v1607_v46, 0.0  ;;  %v1639_v10 = vpack.c.bf16 %v1625_v14, %v1624_v5  ;;  %v1612_v35 = vadd.f32 %v2838_v19, %v1399_v50  ;;  %v2944_v5 = vld [vmem:[%s3797_s5] sm:$0xff]  }
 0x58b   :  { %v1559_v48 = vpop.f32.mrf.mxu1 }
 0x58c   :  { %v1638_v17 = vpack.c.bf16 %v1623_v2, %v1622_v0  ;;  %v1610_v56 = vadd.f32 %v1559_v48, %v1391_v3  ;;  %v1628_v34 = vmax.f32 %v1612_v35, 0.0  ;;  %v1423_v2 = vadd.f32 %v1422_v30, %v3646_v53 }
 0x58d   :  { %v2839_v40 = vpop.f32.mrf.mxu1  ;;  %v1665_v3 = vshrl.u32 %v1664_v9, 7 }
 0x58e   :  { %1787 = vmatmul.mubr.bf16.vlgmr.msra.gmra.mxu0 %v1638_v17  ;;  %v1626_v32 = vmax.f32 %v1610_v56, 0.0  ;;  %v1613_v4 = vadd.f32 %v2839_v40, %v1402_v58  ;;  %v1431_v17 = vadd.f32 %v2814_v45, %v3644_v12  ;;  %v2941_v12 = vld [vmem:[%s3797_s5 + $0x48] sm:$0xff]  }
 0x58f   :  { %1796 = vmatprep.mubr.bf16.mxu0 %v2945_v24  ;;  %v1562_v16 = vpop.f32.mrf.mxu1 }
 0x590   :  { %v1611_v8 = vadd.f32 %v1562_v16, %v1394_v15  ;;  %v1629_v26 = vmax.f32 %v1613_v4, 0.0  ;;  %v2939_v16 = vld [vmem:[%s3797_s5 + $0x50] sm:$0xff]   ;;  %v2943_v15 = vld [vmem:[%s3797_s5 + $0x40] sm:$0xff]  }
 0x591   :  { %v2842_v18 = vpop.f32.mrf.mxu1  ;;  %2474 = vmatprep.subr.bf16.mxu1 %v2939_v16 }
 0x592   :  { %v1627_v7 = vmax.f32 %v1611_v8, 0.0  ;;  %v1641_v42 = vpack.c.bf16 %v1629_v26, %v1628_v34  ;;  %v1616_v63 = vadd.f32 %v2842_v18, %v1415_v28  ;;  %2475 = vmatpush3.bf16.msra.mxu1 %v2940_v23  ;;  %v1666_v8 = vsub.s32 0, %v1665_v3  ;;  %v1662_v18 = vld [vmem:[%s3798_s4] sm:$0x3] }
 0x593   :  { %v1575_v43 = vpop.f32.mrf.mxu1  ;;  %2476 = vmatprep.subr.bf16.mxu1 %v2941_v12 }
 0x594   :  { %v1640_v49 = vpack.c.bf16 %v1627_v7, %v1626_v32  ;;  %v1614_v13 = vadd.f32 %v1575_v43, %v1407_v33  ;;  %v1632_v0 = vmax.f32 %v1616_v63, 0.0  ;;  %v3690_v7 = vrot.slane %v1662_v18, %v1666_v8 }
 0x595   :  { %v2843_v52 = vpop.f32.mrf.mxu1 }
 0x596   :  { %1797 = vmatmul.mubr.bf16.gmra.mxu0 %v1639_v10  ;;  %v1630_v55 = vmax.f32 %v1614_v13, 0.0  ;;  %v1617_v44 = vadd.f32 %v2843_v52, %v1418_v22  ;;  %v1670_v10 = vsub.s32 1, %v1665_v3 }
 0x597   :  { %1806 = vmatprep.mubr.bf16.mxu0 %v2945_v24  ;;  %v1578_v27 = vpop.f32.mrf.mxu1 }
 0x598   :  { %v1615_v11 = vadd.f32 %v1578_v27, %v1410_v31  ;;  %v1633_v46 = vmax.f32 %v1617_v44, 0.0  ;;  %v3688_v38 = vrot.slane %v1662_v18, %v1670_v10 }
 0x599   :  { %v2846_v39 = vpop.f32.mrf.mxu1 }
 0x59a   :  { %v1631_v47 = vmax.f32 %v1615_v11, 0.0  ;;  %v1643_v21 = vpack.c.bf16 %v1633_v46, %v1632_v0  ;;  %v1620_v60 = vadd.f32 %v2846_v39, %v1431_v17 }
 0x59b   :  { %v1591_v20 = vpop.f32.mrf.mxu1 }
 0x59c   :  { %v1642_v36 = vpack.c.bf16 %v1631_v47, %v1630_v55  ;;  %v1618_v48 = vadd.f32 %v1591_v20, %v1423_v2  ;;  %v1636_v53 = vmax.f32 %v1620_v60, 0.0 }
 0x59d   :  { %v2847_v59 = vpop.f32.mrf.mxu1 }
 0x59e   :  { %1807 = vmatmul.mubr.bf16.gmra.mxu0 %v1640_v49  ;;  %v1634_v25 = vmax.f32 %v1618_v48, 0.0  ;;  %v1621_v40 = vadd.f32 %v2847_v59, %v1434_v37 }
 0x59f   :  { %1816 = vmatprep.mubr.bf16.mxu0 %v2945_v24  ;;  %v1594_v19 = vpop.f32.mrf.mxu1 }
 0x5a0   :  { %v1619_v51 = vadd.f32 %v1594_v19, %v1426_v6  ;;  %v1637_v54 = vmax.f32 %v1621_v40, 0.0 }
 0x5a2   :  { %v1635_v57 = vmax.f32 %v1619_v51, 0.0  ;;  %v1645_v14 = vpack.c.bf16 %v1637_v54, %v1636_v53 }
 0x5a4   :  { %v1644_v41 = vpack.c.bf16 %v1635_v57, %v1634_v25 }
 0x5a6   :  { %1817 = vmatmul.mubr.bf16.gmra.mxu0 %v1641_v42 }
 0x5a7   :  { %1826 = vmatprep.mubr.bf16.mxu0 %v2945_v24 }
 0x5ae   :  { %1827 = vmatmul.mubr.bf16.gmra.mxu0 %v1642_v36 }
 0x5af   :  { %1836 = vmatprep.mubr.bf16.mxu0 %v2945_v24 }
 0x5b6   :  { %1837 = vmatmul.mubr.bf16.gmra.mxu0 %v1643_v21 }
 0x5b7   :  { %1846 = vmatprep.mubr.bf16.mxu0 %v2945_v24 }
 0x5be   :  { %1847 = vmatmul.mubr.bf16.gmra.mxu0 %v1644_v41 }
 0x5bf   :  { %1856 = vmatprep.mubr.bf16.mxu0 %v2945_v24  ;;  %v2942_v24 = vld [vmem:[%s3797_s5 + $0x8] sm:$0xff]  }
 0x5c0   :  { %2477 = vmatpush3.bf16.msra.mxu1 %v2942_v24 }
 0x5c1   :  { %2478 = vmatprep.subr.bf16.mxu1 %v2943_v15 }
 0x5c4   :  { %2479 = vmatpush3.bf16.msra.mxu1 %v2944_v5 }
 0x5c6   :  { %1857 = vmatmul.mubr.bf16.gmra.mxu0 %v1645_v14 }
 0x64e   :  { %v1788_v56 = vpop.f32.mrf.mxu0 }
 0x64f   :  { %v1789_v50 = vadd.f32 %v1788_v56, %v3690_v7 }
 0x650   :  { %v1790_v43 = vpop.f32.mrf.mxu0 }
 0x651   :  { %v1791_v32 = vadd.f32 %v1790_v43, %v3688_v38  ;;  %v1867_v27 = vmax.f32 %v1789_v50, 0.0 }
 0x652   :  { %v1792_v58 = vpop.f32.mrf.mxu0 }
 0x653   :  { %v1793_v62 = vadd.f32 %v1792_v58, %v3690_v7  ;;  %v1868_v1 = vmax.f32 %v1791_v32, 0.0 }
 0x654   :  { %v1794_v4 = vpop.f32.mrf.mxu0 }
 0x655   :  { %v1795_v49 = vadd.f32 %v1794_v4, %v3688_v38  ;;  %v1869_v52 = vmax.f32 %v1793_v62, 0.0 }
 0x656   :  { %v1798_v35 = vpop.f32.mrf.mxu0 }
 0x657   :  { %v1870_v26 = vmax.f32 %v1795_v49, 0.0  ;;  %v1899_v45 = vpack.c.bf16 %v1869_v52, %v1867_v27  ;;  %v1799_v39 = vadd.f32 %v1798_v35, %v3690_v7 }
 0x658   :  { %v1800_v31 = vpop.f32.mrf.mxu0 }
 0x659   :  { %v1900_v34 = vpack.c.bf16 %v1870_v26, %v1868_v1  ;;  %v1801_v42 = vadd.f32 %v1800_v31, %v3688_v38  ;;  %v1871_v29 = vmax.f32 %v1799_v39, 0.0 }
 0x65a   :  { %v1802_v33 = vpop.f32.mrf.mxu0 }
 0x65b   :  { %v1803_v11 = vadd.f32 %v1802_v33, %v3690_v7  ;;  %2082 = vmatprep.mubr.bf16.mxu1 %v1900_v34  ;;  %v1872_v22 = vmax.f32 %v1801_v42, 0.0 }
 0x65c   :  { %v1804_v13 = vpop.f32.mrf.mxu0  ;;  %2083 = vmatmul.mubr.bf16.vlgmr.msra.gmra.mxu1 %v1899_v45 }
 0x65d   :  { %v1805_v30 = vadd.f32 %v1804_v13, %v3688_v38  ;;  %v1873_v47 = vmax.f32 %v1803_v11, 0.0 }
 0x65e   :  { %v1808_v20 = vpop.f32.mrf.mxu0 }
 0x65f   :  { %v1874_v55 = vmax.f32 %v1805_v30, 0.0  ;;  %v1901_v36 = vpack.c.bf16 %v1873_v47, %v1871_v29  ;;  %v1809_v46 = vadd.f32 %v1808_v20, %v3690_v7 }
 0x660   :  { %v1810_v28 = vpop.f32.mrf.mxu0 }
 0x661   :  { %v1902_v44 = vpack.c.bf16 %v1874_v55, %v1872_v22  ;;  %v1811_v63 = vadd.f32 %v1810_v28, %v3688_v38  ;;  %v1875_v48 = vmax.f32 %v1809_v46, 0.0 }
 0x662   :  { %v1812_v59 = vpop.f32.mrf.mxu0 }
 0x663   :  { %v1813_v61 = vadd.f32 %v1812_v59, %v3690_v7  ;;  %2090 = vmatprep.mubr.bf16.mxu1 %v1902_v44  ;;  %v1876_v21 = vmax.f32 %v1811_v63, 0.0 }
 0x664   :  { %v1814_v19 = vpop.f32.mrf.mxu0  ;;  %2091 = vmatmul.mubr.bf16.gmra.mxu1 %v1901_v36 }
 0x665   :  { %v1815_v6 = vadd.f32 %v1814_v19, %v3688_v38  ;;  %v1877_v0 = vmax.f32 %v1813_v61, 0.0 }
 0x666   :  { %v1818_v2 = vpop.f32.mrf.mxu0 }
 0x667   :  { %v1878_v51 = vmax.f32 %v1815_v6, 0.0  ;;  %v1903_v25 = vpack.c.bf16 %v1877_v0, %v1875_v48  ;;  %v1819_v60 = vadd.f32 %v1818_v2, %v3690_v7 }
 0x668   :  { %v1820_v57 = vpop.f32.mrf.mxu0 }
 0x669   :  { %v1904_v37 = vpack.c.bf16 %v1878_v51, %v1876_v21  ;;  %v1821_v40 = vadd.f32 %v1820_v57, %v3688_v38  ;;  %v1879_v24 = vmax.f32 %v1819_v60, 0.0 }
 0x66a   :  { %v1822_v17 = vpop.f32.mrf.mxu0 }
 0x66b   :  { %v1823_v41 = vadd.f32 %v1822_v17, %v3690_v7  ;;  %2098 = vmatprep.mubr.bf16.mxu1 %v1904_v37  ;;  %v1880_v23 = vmax.f32 %v1821_v40, 0.0 }
 0x66c   :  { %v1824_v54 = vpop.f32.mrf.mxu0  ;;  %2099 = vmatmul.mubr.bf16.gmra.mxu1 %v1903_v25 }
 0x66d   :  { %v1825_v53 = vadd.f32 %v1824_v54, %v3688_v38  ;;  %v1881_v14 = vmax.f32 %v1823_v41, 0.0 }
 0x66e   :  { %v1828_v16 = vpop.f32.mrf.mxu0 }
 0x66f   :  { %v1882_v12 = vmax.f32 %v1825_v53, 0.0  ;;  %v1905_v9 = vpack.c.bf16 %v1881_v14, %v1879_v24  ;;  %v1829_v18 = vadd.f32 %v1828_v16, %v3690_v7  ;;  %v3727_v16 = vld [vmem:[%s3799_s6] ss:$0 sm:$0xff] }
 0x670   :  { %v1830_v15 = vpop.f32.mrf.mxu0 }
 0x671   :  { %v1906_v5 = vpack.c.bf16 %v1882_v12, %v1880_v23  ;;  %v1831_v10 = vadd.f32 %v1830_v15, %v3688_v38  ;;  %v1883_v4 = vmax.f32 %v1829_v18, 0.0 }
 0x672   :  { %v1832_v3 = vpop.f32.mrf.mxu0 }
 0x673   :  { %v1833_v8 = vadd.f32 %v1832_v3, %v3690_v7  ;;  %2106 = vmatprep.mubr.bf16.mxu1 %v1906_v5  ;;  %v1884_v62 = vmax.f32 %v1831_v10, 0.0 }
 0x674   :  { %v1834_v56 = vpop.f32.mrf.mxu0  ;;  %2107 = vmatmul.mubr.bf16.gmra.mxu1 %v1905_v9 }
 0x675   :  { %v1835_v43 = vadd.f32 %v1834_v56, %v3688_v38  ;;  %v1885_v58 = vmax.f32 %v1833_v8, 0.0 }
 0x676   :  { %v1838_v32 = vpop.f32.mrf.mxu0 }
 0x677   :  { %v1886_v50 = vmax.f32 %v1835_v43, 0.0  ;;  %v1907_v35 = vpack.c.bf16 %v1885_v58, %v1883_v4  ;;  %v1839_v31 = vadd.f32 %v1838_v32, %v3690_v7 }
 0x678   :  { %v1840_v49 = vpop.f32.mrf.mxu0 }
 0x679   :  { %v1908_v52 = vpack.c.bf16 %v1886_v50, %v1884_v62  ;;  %v1841_v26 = vadd.f32 %v1840_v49, %v3688_v38  ;;  %v1887_v13 = vmax.f32 %v1839_v31, 0.0 }
 0x67a   :  { %v1842_v1 = vpop.f32.mrf.mxu0 }
 0x67b   :  { %v1843_v27 = vadd.f32 %v1842_v1, %v3690_v7  ;;  %2114 = vmatprep.mubr.bf16.mxu1 %v1908_v52  ;;  %v1888_v11 = vmax.f32 %v1841_v26, 0.0 }
 0x67c   :  { %v1844_v34 = vpop.f32.mrf.mxu0  ;;  %2115 = vmatmul.mubr.bf16.gmra.mxu1 %v1907_v35 }
 0x67d   :  { %v1845_v45 = vadd.f32 %v1844_v34, %v3688_v38  ;;  %v1889_v33 = vmax.f32 %v1843_v27, 0.0 }
 0x67e   :  { %v1848_v42 = vpop.f32.mrf.mxu0 }
 0x67f   :  { %v1890_v39 = vmax.f32 %v1845_v45, 0.0  ;;  %v1909_v20 = vpack.c.bf16 %v1889_v33, %v1887_v13  ;;  %v1849_v28 = vadd.f32 %v1848_v42, %v3690_v7 }
 0x680   :  { %v1850_v30 = vpop.f32.mrf.mxu0 }
 0x681   :  { %v1910_v47 = vpack.c.bf16 %v1890_v39, %v1888_v11  ;;  %v1851_v55 = vadd.f32 %v1850_v30, %v3688_v38  ;;  %v1891_v19 = vmax.f32 %v1849_v28, 0.0 }
 0x682   :  { %v1852_v22 = vpop.f32.mrf.mxu0 }
 0x683   :  { %v1853_v29 = vadd.f32 %v1852_v22, %v3690_v7  ;;  %2122 = vmatprep.mubr.bf16.mxu1 %v1910_v47  ;;  %v1892_v61 = vmax.f32 %v1851_v55, 0.0 }
 0x684   :  { %v1854_v44 = vpop.f32.mrf.mxu0  ;;  %2123 = vmatmul.mubr.bf16.gmra.mxu1 %v1909_v20 }
 0x685   :  { %v1855_v36 = vadd.f32 %v1854_v44, %v3688_v38  ;;  %v1893_v59 = vmax.f32 %v1853_v29, 0.0 }
 0x686   :  { %v1858_v63 = vpop.f32.mrf.mxu0 }
 0x687   :  { %v1894_v46 = vmax.f32 %v1855_v36, 0.0  ;;  %v1911_v2 = vpack.c.bf16 %v1893_v59, %v1891_v19  ;;  %v1859_v57 = vadd.f32 %v1858_v63, %v3690_v7 }
 0x688   :  { %v1860_v6 = vpop.f32.mrf.mxu0 }
 0x689   :  { %v1912_v0 = vpack.c.bf16 %v1894_v46, %v1892_v61  ;;  %v1861_v51 = vadd.f32 %v1860_v6, %v3688_v38  ;;  %v1895_v60 = vmax.f32 %v1859_v57, 0.0 }
 0x68a   :  { %v1862_v21 = vpop.f32.mrf.mxu0 }
 0x68b   :  { %v1863_v48 = vadd.f32 %v1862_v21, %v3690_v7  ;;  %2130 = vmatprep.mubr.bf16.mxu1 %v1912_v0  ;;  %v1896_v40 = vmax.f32 %v1861_v51, 0.0 }
 0x68c   :  { %v1864_v37 = vpop.f32.mrf.mxu0  ;;  %2131 = vmatmul.mubr.bf16.gmra.mxu1 %v1911_v2 }
 0x68d   :  { %v1865_v25 = vadd.f32 %v1864_v37, %v3688_v38  ;;  %v1897_v17 = vmax.f32 %v1863_v48, 0.0 }
 0x68f   :  { %v1898_v41 = vmax.f32 %v1865_v25, 0.0  ;;  %v1913_v53 = vpack.c.bf16 %v1897_v17, %v1895_v60 }
 0x691   :  { %v1914_v54 = vpack.c.bf16 %v1898_v41, %v1896_v40 }
 0x693   :  { %2138 = vmatprep.mubr.bf16.mxu1 %v1914_v54 }
 0x694   :  { %2139 = vmatmul.mubr.bf16.gmra.mxu1 %v1913_v53 }
 0x71c   :  { %v2480_v14 = vpop.f32.mrf.mxu1 }
 0x71e   :  { %v2481_v23 = vpop.f32.mrf.mxu1 }
 0x71f   :  { %v2482_v7 = vadd.f32 %v2481_v23, %v2480_v14 }
 0x720   :  { %v2483_v12 = vpop.f32.mrf.mxu1 }
 0x721   :  { %v2085_v24 = vadd.f32 %v2482_v7, %v3727_v16 }
 0x722   :  { %v2484_v38 = vpop.f32.mrf.mxu1 }
 0x723   :  { %2147 = vst [vmem:[%s3800_s7] sm:$0xff] %v2085_v24  ;;  %v2485_v15 = vadd.f32 %v2484_v38, %v2483_v12 }
 0x724   :  { %v2486_v5 = vpop.f32.mrf.mxu1 }
 0x725   :  { %v2088_v9 = vadd.f32 %v2485_v15, %v3727_v16 }
 0x726   :  { %v2487_v3 = vpop.f32.mrf.mxu1 }
 0x727   :  { %2148 = vst [vmem:[%s3800_s7 + $0x8] sm:$0xff] %v2088_v9  ;;  %v2488_v10 = vadd.f32 %v2487_v3, %v2486_v5 }
 0x728   :  { %v2489_v8 = vpop.f32.mrf.mxu1 }
 0x729   :  { %v2093_v18 = vadd.f32 %v2488_v10, %v3727_v16 }
 0x72a   :  { %v2490_v56 = vpop.f32.mrf.mxu1 }
 0x72b   :  { %2149 = vst [vmem:[%s3800_s7 + $0x10] sm:$0xff] %v2093_v18  ;;  %v2491_v43 = vadd.f32 %v2490_v56, %v2489_v8 }
 0x72c   :  { %v2492_v58 = vpop.f32.mrf.mxu1 }
 0x72d   :  { %v2096_v32 = vadd.f32 %v2491_v43, %v3727_v16 }
 0x72e   :  { %v2493_v62 = vpop.f32.mrf.mxu1 }
 0x72f   :  { %2150 = vst [vmem:[%s3800_s7 + $0x18] sm:$0xff] %v2096_v32  ;;  %v2494_v50 = vadd.f32 %v2493_v62, %v2492_v58 }
 0x730   :  { %v2495_v4 = vpop.f32.mrf.mxu1 }
 0x731   :  { %v2101_v49 = vadd.f32 %v2494_v50, %v3727_v16 }
 0x732   :  { %v2496_v52 = vpop.f32.mrf.mxu1 }
 0x733   :  { %2151 = vst [vmem:[%s3800_s7 + $0x20] sm:$0xff] %v2101_v49  ;;  %v2497_v35 = vadd.f32 %v2496_v52, %v2495_v4 }
 0x734   :  { %v2498_v1 = vpop.f32.mrf.mxu1 }
 0x735   :  { %v2104_v26 = vadd.f32 %v2497_v35, %v3727_v16 }
 0x736   :  { %v2499_v27 = vpop.f32.mrf.mxu1 }
 0x737   :  { %2152 = vst [vmem:[%s3800_s7 + $0x28] sm:$0xff] %v2104_v26  ;;  %v2500_v31 = vadd.f32 %v2499_v27, %v2498_v1 }
 0x738   :  { %v2501_v34 = vpop.f32.mrf.mxu1 }
 0x739   :  { %v2109_v45 = vadd.f32 %v2500_v31, %v3727_v16 }
 0x73a   :  { %v2502_v33 = vpop.f32.mrf.mxu1 }
 0x73b   :  { %2153 = vst [vmem:[%s3800_s7 + $0x30] sm:$0xff] %v2109_v45  ;;  %v2503_v42 = vadd.f32 %v2502_v33, %v2501_v34 }
 0x73c   :  { %v2504_v11 = vpop.f32.mrf.mxu1 }
 0x73d   :  { %v2112_v39 = vadd.f32 %v2503_v42, %v3727_v16 }
 0x73e   :  { %v2505_v13 = vpop.f32.mrf.mxu1 }
 0x73f   :  { %2154 = vst [vmem:[%s3800_s7 + $0x38] sm:$0xff] %v2112_v39  ;;  %v2506_v30 = vadd.f32 %v2505_v13, %v2504_v11 }
 0x740   :  { %v2507_v47 = vpop.f32.mrf.mxu1 }
 0x741   :  { %v2117_v20 = vadd.f32 %v2506_v30, %v3727_v16 }
 0x742   :  { %v2508_v22 = vpop.f32.mrf.mxu1 }
 0x743   :  { %2155 = vst [vmem:[%s3800_s7 + $0x40] sm:$0xff] %v2117_v20  ;;  %v2509_v55 = vadd.f32 %v2508_v22, %v2507_v47 }
 0x744   :  { %v2510_v29 = vpop.f32.mrf.mxu1 }
 0x745   :  { %v2120_v28 = vadd.f32 %v2509_v55, %v3727_v16 }
 0x746   :  { %v2511_v44 = vpop.f32.mrf.mxu1 }
 0x747   :  { %2156 = vst [vmem:[%s3800_s7 + $0x48] sm:$0xff] %v2120_v28  ;;  %v2512_v36 = vadd.f32 %v2511_v44, %v2510_v29 }
 0x748   :  { %v2513_v59 = vpop.f32.mrf.mxu1 }
 0x749   :  { %v2125_v63 = vadd.f32 %v2512_v36, %v3727_v16 }
 0x74a   :  { %v2514_v61 = vpop.f32.mrf.mxu1 }
 0x74b   :  { %2157 = vst [vmem:[%s3800_s7 + $0x50] sm:$0xff] %v2125_v63  ;;  %v2515_v46 = vadd.f32 %v2514_v61, %v2513_v59 }
 0x74c   :  { %v2516_v19 = vpop.f32.mrf.mxu1 }
 0x74d   :  { %v2128_v6 = vadd.f32 %v2515_v46, %v3727_v16 }
 0x74e   :  { %v2517_v0 = vpop.f32.mrf.mxu1 }
 0x74f   :  { %2158 = vst [vmem:[%s3800_s7 + $0x58] sm:$0xff] %v2128_v6  ;;  %v2518_v2 = vadd.f32 %v2517_v0, %v2516_v19 }
 0x750   :  { %v2519_v21 = vpop.f32.mrf.mxu1 }
 0x751   :  { %v2133_v51 = vadd.f32 %v2518_v2, %v3727_v16 }
 0x752   :  { %v2520_v48 = vpop.f32.mrf.mxu1 }
 0x753   :  { %2159 = vst [vmem:[%s3800_s7 + $0x60] sm:$0xff] %v2133_v51  ;;  %v2521_v57 = vadd.f32 %v2520_v48, %v2519_v21 }
 0x754   :  { %v2522_v37 = vpop.f32.mrf.mxu1 }
 0x755   :  { %v2136_v25 = vadd.f32 %v2521_v57, %v3727_v16 }
 0x756   :  { %v2523_v17 = vpop.f32.mrf.mxu1 }
 0x757   :  { %2160 = vst [vmem:[%s3800_s7 + $0x68] sm:$0xff] %v2136_v25  ;;  %v2524_v40 = vadd.f32 %v2523_v17, %v2522_v37 }
 0x758   :  { %v2525_v41 = vpop.f32.mrf.mxu1 }
 0x759   :  { %v2141_v60 = vadd.f32 %v2524_v40, %v3727_v16 }
 0x75a   :  { %v2526_v54 = vpop.f32.mrf.mxu1 }
 0x75b   :  { %2161 = vst [vmem:[%s3800_s7 + $0x70] sm:$0xff] %v2141_v60  ;;  %v2527_v53 = vadd.f32 %v2526_v54, %v2525_v41 }
 0x75d   :  { %v2144_v14 = vadd.f32 %v2527_v53, %v3727_v16 }
 0x75f   :  { %2162 = vst [vmem:[%s3800_s7 + $0x78] sm:$0xff] %v2144_v14 }

</bundles_post_ra>
